<compile_context>
chip_gen: v5e
topology: v5e:2x2
jax: 0.10.0
libtpu: 0.0.40
codegen_flags: <defaults>
</compile_context>

<pallas_src>
import functools

import jax
import jax.numpy as jnp
from jax.experimental import pallas as pl
from jax.experimental.pallas import tpu as pltpu

# bf16 inputs + f32 accumulation is the portable high-throughput MXU path on
# v5e / v6e / v7x (v7x has no int MXU; LN/softmax/GELU math stays f32).
MXU_DTYPE = jnp.bfloat16

# Largest M-tile for row-tiled kernels.
MAX_TILE_M = 256


def _tile_rows(m, max_tile=MAX_TILE_M):
    return m if m <= max_tile else max_tile


def _pick_bb(bs, max_bb=8):
    """Batch rows per transformer grid step: largest divisor of bs (<= max_bb)
    that still leaves >=2 parallel grid steps (v7x has 2 TensorCores)."""
    for cand in range(min(bs, max_bb), 0, -1):
        if bs % cand == 0 and bs // cand >= 2:
            return cand
    return 1


def _resident(a):
    """Full-array block with a constant index_map -> stays resident in VMEM."""
    nd = a.ndim
    return pl.BlockSpec(a.shape, lambda *_, _nd=nd: (0,) * _nd)


# ----------------------------- Pallas kernels ------------------------------

def _backbone_mlp_kernel(x_ref, wb, bb_, w1, b1, w2, b2, o_ref):
    """Fused backbone stub + frame MLP:
       (BT, C) -> Linear(C, 2048) -> Linear(2048, mlp_dim) -> GELU
               -> Linear(mlp_dim, dim).  (Dropout = identity.)"""
    x = x_ref[...].astype(jnp.float32)
    h0 = jnp.dot(x.astype(wb.dtype), wb[...],
                 preferred_element_type=jnp.float32) + bb_[...]
    h1 = jnp.dot(h0.astype(w1.dtype), w1[...],
                 preferred_element_type=jnp.float32) + b1[...]
    # TODO(synk): tanh-approx GELU; PyTorch nn.GELU() default is exact erf.
    h1 = jax.nn.gelu(h1, approximate=True)
    y = jnp.dot(h1.astype(w2.dtype), w2[...],
                preferred_element_type=jnp.float32) + b2[...]
    o_ref[...] = y.astype(o_ref.dtype)


def _transformer_stack_kernel(x_ref, ln1g, ln1b, wqkv, wo, bo,
                              ln2g, ln2b, fw1, fb1, fw2, fb2,
                              o_ref, carry,
                              *, heads, dim_head, eps):
    """Full pre-norm transformer stack.  grid=(batch_tiles, depth); the layer
    axis streams stacked weights while the activation carry stays in VMEM."""
    l = pl.program_id(1)
    depth = pl.num_programs(1)

    bb_, t, d = carry.shape
    m = bb_ * t
    hdh = heads * dim_head

    @pl.when(l == 0)
    def _():
        carry[...] = x_ref[...].astype(jnp.float32)

    x = carry[...].reshape(m, d)                                     # (M, D) f32

    # ---- LN1 (fused into the QKV projection) ----
    mu = jnp.mean(x, axis=-1, keepdims=True)
    var = jnp.mean(jnp.square(x - mu), axis=-1, keepdims=True)
    xn = (x - mu) * jax.lax.rsqrt(var + eps) * ln1g[...] + ln1b[...]

    # ---- fused QKV projection (no bias; softmax scale folded into Q cols) ----
    qkv = jnp.dot(xn.astype(wqkv.dtype), wqkv[...],
                  preferred_element_type=jnp.float32)                # (M, 3*H*Dh)

    # ---- attention: per-head scores (inherently K=Dh), static unroll ----
    o_heads = []
    for h in range(heads):
        q = qkv[:, h * dim_head:(h + 1) * dim_head].reshape(bb_, t, dim_head)
        k = qkv[:, hdh + h * dim_head: hdh + (h + 1) * dim_head
                ].reshape(bb_, t, dim_head)
        v = qkv[:, 2 * hdh + h * dim_head: 2 * hdh + (h + 1) * dim_head
                ].reshape(bb_, t, dim_head)
        s = jnp.einsum("bqd,bkd->bqk", q, k,
                       preferred_element_type=jnp.float32)           # (Bb, T, T)
        s = s - jnp.max(s, axis=-1, keepdims=True)
        p = jnp.exp(s)
        p = p * pl.reciprocal(jnp.sum(p, axis=-1, keepdims=True), approx=True)
        oh = jnp.einsum("bqk,bkd->bqd", p, v,
                        preferred_element_type=jnp.float32)          # (Bb, T, Dh)
        o_heads.append(oh.reshape(m, dim_head))
    o = jnp.concatenate(o_heads, axis=-1)                            # (M, H*Dh)

    # ---- single output projection + residual ----
    x1 = x + jnp.dot(o.astype(wo.dtype), wo[...],
                     preferred_element_type=jnp.float32) + bo[...]

    # ---- LN2 + FFN + residual ----
    mu2 = jnp.mean(x1, axis=-1, keepdims=True)
    var2 = jnp.mean(jnp.square(x1 - mu2), axis=-1, keepdims=True)
    x1n = (x1 - mu2) * jax.lax.rsqrt(var2 + eps) * ln2g[...] + ln2b[...]
    hdn = jnp.dot(x1n.astype(fw1.dtype), fw1[...],
                  preferred_element_type=jnp.float32) + fb1[...]
    hdn = jax.nn.gelu(hdn, approximate=True)
    y = x1 + jnp.dot(hdn.astype(fw2.dtype), fw2[...],
                     preferred_element_type=jnp.float32) + fb2[...]

    carry[...] = y.reshape(bb_, t, d)

    @pl.when(l == depth - 1)
    def _():
        o_ref[...] = carry[...].astype(o_ref.dtype)


def _ln_linear_kernel(x_ref, g_ref, b_ref, w_ref, bias_ref, o_ref, *, eps):
    """Classifier head: LayerNorm fused into the (lane-padded) Linear."""
    x = x_ref[...].astype(jnp.float32)
    mu = jnp.mean(x, axis=-1, keepdims=True)
    var = jnp.mean(jnp.square(x - mu), axis=-1, keepdims=True)
    xn = (x - mu) * jax.lax.rsqrt(var + eps) * g_ref[...] + b_ref[...]
    y = jnp.dot(xn.astype(w_ref.dtype), w_ref[...],
                preferred_element_type=jnp.float32) + bias_ref[...]
    o_ref[...] = y.astype(o_ref.dtype)


# ------------------------------ kernel wrappers ------------------------------

def backbone_mlp(feat, wb, bbias, w1, b1, w2, b2):
    m, c = feat.shape
    dim = w2.shape[1]
    wb = wb.astype(MXU_DTYPE)
    w1 = w1.astype(MXU_DTYPE)
    w2 = w2.astype(MXU_DTYPE)
    tile = _tile_rows(m)
    return pl.pallas_call(
        _backbone_mlp_kernel,
        out_shape=jax.ShapeDtypeStruct((m, dim), MXU_DTYPE),
        grid=(pl.cdiv(m, tile),),
        in_specs=[pl.BlockSpec((tile, c), lambda i: (i, 0)),
                  _resident(wb), _resident(bbias),
                  _resident(w1), _resident(b1),
                  _resident(w2), _resident(b2)],
        out_specs=pl.BlockSpec((tile, dim), lambda i: (i, 0)),
        compiler_params=pltpu.CompilerParams(
            dimension_semantics=("parallel",),
            vmem_limit_bytes=48 * 1024 * 1024),
    )(feat, wb, bbias, w1, b1, w2, b2)


def transformer_stack(x, lp, *, heads, dim_head):
    bs, t, dim = x.shape
    depth = lp["wqkv"].shape[0]
    hdh = heads * dim_head
    scale = dim_head ** -0.5

    # Fold the softmax scale into the Q columns of the fused QKV weight
    # (free relative to the bf16 cast that happens anyway).
    qscale = jnp.concatenate([jnp.full((hdh,), scale, jnp.float32),
                              jnp.ones((2 * hdh,), jnp.float32)])
    wqkv = (lp["wqkv"] * qscale).astype(MXU_DTYPE)
    wo = lp["wo"].astype(MXU_DTYPE)
    fw1 = lp["ff_w1"].astype(MXU_DTYPE)
    fw2 = lp["ff_w2"].astype(MXU_DTYPE)

    bb_ = _pick_bb(bs)
    nb = bs // bb_

    x_spec = pl.BlockSpec((bb_, t, dim), lambda b, l: (b, 0, 0))

    def layer_spec(a):
        # Stacked per-layer array (depth, ...): stream one layer per l step.
        return pl.BlockSpec((None,) + a.shape[1:], lambda b, l: (l, 0, 0))

    inputs = (x.astype(MXU_DTYPE),
              lp["ln1_g"], lp["ln1_b"], wqkv, wo, lp["bo"],
              lp["ln2_g"], lp["ln2_b"], fw1, lp["ff_b1"], fw2, lp["ff_b2"])
    in_specs = [x_spec] + [layer_spec(a) for a in inputs[1:]]

    return pl.pallas_call(
        functools.partial(_transformer_stack_kernel,
                          heads=heads, dim_head=dim_head, eps=1e-5),
        out_shape=jax.ShapeDtypeStruct((bs, t, dim), MXU_DTYPE),
        grid=(nb, depth),
        in_specs=in_specs,
        out_specs=x_spec,
        scratch_shapes=[pltpu.VMEM((bb_, t, dim), jnp.float32)],
        compiler_params=pltpu.CompilerParams(
            dimension_semantics=("parallel", "arbitrary"),
            vmem_limit_bytes=48 * 1024 * 1024),
    )(*inputs)


def ln_linear_head(x, g, b, w, bias, num_class, eps=1e-5):
    m, d = x.shape
    n_pad = ((num_class + 127) // 128) * 128            # lane-dense output width
    w_p = jnp.pad(w, ((0, 0), (0, n_pad - num_class))).astype(MXU_DTYPE)
    bias_p = jnp.pad(bias.reshape(1, -1), ((0, 0), (0, n_pad - num_class)))
    tile = _tile_rows(m)
    out = pl.pallas_call(
        functools.partial(_ln_linear_kernel, eps=eps),
        out_shape=jax.ShapeDtypeStruct((m, n_pad), jnp.float32),
        grid=(pl.cdiv(m, tile),),
        in_specs=[pl.BlockSpec((tile, d), lambda i: (i, 0)),
                  _resident(g), _resident(b), _resident(w_p), _resident(bias_p)],
        out_specs=pl.BlockSpec((tile, n_pad), lambda i: (i, 0)),
        compiler_params=pltpu.CompilerParams(dimension_semantics=("parallel",)),
    )(x, g, b, w_p, bias_p)
    return out[:, :num_class]


# ----------------------------- parameter setup ------------------------------

def init_params(key, *, num_class, dim, depth, heads, dim_head, mlp_dim, in_channels):
    hdh = heads * dim_head
    keys = iter(jax.random.split(key, 16))

    def w(shape, scale=0.02):
        return (scale * jax.random.normal(next(keys), shape)).astype(jnp.float32)

    return {
        # Backbone stub: Linear(C, 2048) applied to per-frame GAP features.
        "backbone_w": w((in_channels, 2048)),
        "backbone_b": jnp.zeros((1, 2048), jnp.float32),
        # MLP(2048, dim, mlp_dim) = Linear(2048, mlp_dim)->GELU->Linear(mlp_dim, dim)
        "mlp_w1": w((2048, mlp_dim)), "mlp_b1": jnp.zeros((1, mlp_dim), jnp.float32),
        "mlp_w2": w((mlp_dim, dim)), "mlp_b2": jnp.zeros((1, dim), jnp.float32),
        # Transformer: per-layer weights stacked along a leading depth axis.
        "layers": {
            "ln1_g": jnp.ones((depth, 1, dim), jnp.float32),
            "ln1_b": jnp.zeros((depth, 1, dim), jnp.float32),
            # fused to_qkv (no bias): columns are [Q | K | V], head-major inside.
            "wqkv": w((depth, dim, 3 * hdh)),
            "wo": w((depth, hdh, dim)),
            "bo": jnp.zeros((depth, 1, dim), jnp.float32),
            "ln2_g": jnp.ones((depth, 1, dim), jnp.float32),
            "ln2_b": jnp.zeros((depth, 1, dim), jnp.float32),
            "ff_w1": w((depth, dim, mlp_dim)),
            "ff_b1": jnp.zeros((depth, 1, mlp_dim), jnp.float32),
            "ff_w2": w((depth, mlp_dim, dim)),
            "ff_b2": jnp.zeros((depth, 1, dim), jnp.float32),
        },
        "fc1_g": jnp.ones((1, dim), jnp.float32),
        "fc1_b": jnp.zeros((1, dim), jnp.float32),
        "fc1_w": w((dim, num_class)),
        "fc1_bias": jnp.zeros((num_class,), jnp.float32),
        "fc2_g": jnp.ones((1, dim), jnp.float32),
        "fc2_b": jnp.zeros((1, dim), jnp.float32),
        "fc2_w": w((dim, num_class)),
        "fc2_bias": jnp.zeros((num_class,), jnp.float32),
    }


# ------------------------------- forward pass -------------------------------

def islr_forward(params, video, *, heads, dim_head, pool="gap"):
    bs, c, t, h, w = video.shape
    # Backbone stub: per-frame global-average-pool over (h, w) -> (bs*t, c).
    feat = jnp.transpose(jnp.mean(video, axis=(3, 4)), (0, 2, 1)).reshape(bs * t, c)

    # Fused backbone-projection + frame MLP, one kernel.
    x = backbone_mlp(feat, params["backbone_w"], params["backbone_b"],
                     params["mlp_w1"], params["mlp_b1"],
                     params["mlp_w2"], params["mlp_b2"])             # (bs*t, dim) bf16
    dim = x.shape[-1]
    x = x.reshape(bs, t, dim)

    # Temporal transformer: all layers in one fused pallas_call.
    y = transformer_stack(x, params["layers"], heads=heads, dim_head=dim_head)

    # Matches the PyTorch reference: mean over frames iff pool == 'mean',
    # otherwise the last-frame token.
    pooled = y.mean(axis=1) if pool == "mean" else y[:, -1]          # (bs, dim)

    out1 = ln_linear_head(pooled, params["fc1_g"], params["fc1_b"],
                          params["fc1_w"], params["fc1_bias"],
                          params["fc1_w"].shape[1])                  # (bs, num_class)
    out2 = ln_linear_head(y.reshape(bs * t, dim), params["fc2_g"], params["fc2_b"],
                          params["fc2_w"], params["fc2_bias"],
                          params["fc2_w"].shape[1]).reshape(bs, t, -1)
    return out1, out2


# ---------------------------------- main ------------------------------------

if __name__ == "__main__":
    bs, c, t, h, w = 2, 3, 8, 16, 16
    num_class, dim, depth, heads, dim_head, mlp_dim = 10, 32, 2, 4, 8, 64

    key = jax.random.PRNGKey(0)
    pkey, vkey = jax.random.split(key)
    params = init_params(pkey, num_class=num_class, dim=dim, depth=depth,
                         heads=heads, dim_head=dim_head, mlp_dim=mlp_dim,
                         in_channels=c)
    video = jax.random.normal(vkey, (bs, c, t, h, w), dtype=jnp.float32)

    fwd = jax.jit(functools.partial(islr_forward, heads=heads,
                                    dim_head=dim_head, pool="gap"))
    out1, out2 = fwd(params, video)
    jax.block_until_ready((out1, out2))
    assert out1.shape == (bs, num_class), out1.shape
    assert out2.shape == (bs, t, num_class), out2.shape
    print("KERNEL_OK")
</pallas_src>

<mosaic_0001>
module attributes {stable_mosaic.version = 11 : i64} {
  func.func @_backbone_mlp_kernel(%arg0: i32, %arg1: memref<16x3xf32, #tpu.memory_space<vmem>>, %arg2: memref<3x2048xbf16, #tpu.memory_space<vmem>>, %arg3: memref<1x2048xf32, #tpu.memory_space<vmem>>, %arg4: memref<2048x64xbf16, #tpu.memory_space<vmem>>, %arg5: memref<1x64xf32, #tpu.memory_space<vmem>>, %arg6: memref<64x32xbf16, #tpu.memory_space<vmem>>, %arg7: memref<1x32xf32, #tpu.memory_space<vmem>>, %arg8: memref<16x32xbf16, #tpu.memory_space<vmem>>) attributes {dimension_semantics = [#tpu.dimension_semantics<parallel>], iteration_bounds = array<i64: 1>, scalar_prefetch = 0 : i64, scratch_operands = 0 : i64, tpu.core_type = #tpu.core_type<tc>, window_params = [{transform_indices = @transform_0, window_bounds = array<i64: 16, 3>}, {pipeline_mode = #tpu.pipeline_mode<synchronous>, transform_indices = @transform_1, window_bounds = array<i64: 3, 2048>}, {pipeline_mode = #tpu.pipeline_mode<synchronous>, transform_indices = @transform_2, window_bounds = array<i64: 1, 2048>}, {pipeline_mode = #tpu.pipeline_mode<synchronous>, transform_indices = @transform_3, window_bounds = array<i64: 2048, 64>}, {pipeline_mode = #tpu.pipeline_mode<synchronous>, transform_indices = @transform_4, window_bounds = array<i64: 1, 64>}, {pipeline_mode = #tpu.pipeline_mode<synchronous>, transform_indices = @transform_5, window_bounds = array<i64: 64, 32>}, {pipeline_mode = #tpu.pipeline_mode<synchronous>, transform_indices = @transform_6, window_bounds = array<i64: 1, 32>}, {transform_indices = @transform_7, window_bounds = array<i64: 16, 32>}]} {
    %c0 = arith.constant 0 : index
    %c0_0 = arith.constant 0 : index
    %0 = vector.load %arg1[%c0, %c0_0] : memref<16x3xf32, #tpu.memory_space<vmem>>, vector<16x3xf32>
    %1 = arith.truncf %0 : vector<16x3xf32> to vector<16x3xbf16>
    %c0_1 = arith.constant 0 : index
    %c0_2 = arith.constant 0 : index
    %2 = vector.load %arg2[%c0_1, %c0_2] : memref<3x2048xbf16, #tpu.memory_space<vmem>>, vector<3x2048xbf16>
    %cst = arith.constant dense<0.000000e+00> : vector<16x2048xf32>
    %3 = tpu.matmul %1, %2, %cst {dimension_numbers = #tpu.dot_dimension_numbers<[1], [0], [0], [1], [0, 0, 1, 1], [], []>} : vector<16x3xbf16>, vector<3x2048xbf16>, vector<16x2048xf32> -> vector<16x2048xf32>
    %c0_3 = arith.constant 0 : index
    %c0_4 = arith.constant 0 : index
    %4 = vector.load %arg3[%c0_3, %c0_4] : memref<1x2048xf32, #tpu.memory_space<vmem>>, vector<1x2048xf32>
    %5 = vector.broadcast %4 : vector<1x2048xf32> to vector<16x2048xf32>
    %6 = arith.addf %3, %5 : vector<16x2048xf32>
    %7 = arith.truncf %6 : vector<16x2048xf32> to vector<16x2048xbf16>
    %c0_5 = arith.constant 0 : index
    %c0_6 = arith.constant 0 : index
    %8 = vector.load %arg4[%c0_5, %c0_6] : memref<2048x64xbf16, #tpu.memory_space<vmem>>, vector<2048x64xbf16>
    %cst_7 = arith.constant dense<0.000000e+00> : vector<16x64xf32>
    %9 = tpu.matmul %7, %8, %cst_7 {dimension_numbers = #tpu.dot_dimension_numbers<[1], [0], [0], [1], [0, 0, 1, 1], [], []>} : vector<16x2048xbf16>, vector<2048x64xbf16>, vector<16x64xf32> -> vector<16x64xf32>
    %c0_8 = arith.constant 0 : index
    %c0_9 = arith.constant 0 : index
    %10 = vector.load %arg5[%c0_8, %c0_9] : memref<1x64xf32, #tpu.memory_space<vmem>>, vector<1x64xf32>
    %11 = vector.broadcast %10 : vector<1x64xf32> to vector<16x64xf32>
    %12 = arith.addf %9, %11 : vector<16x64xf32>
    %13 = arith.mulf %12, %12 : vector<16x64xf32>
    %14 = arith.mulf %12, %13 : vector<16x64xf32>
    %cst_10 = arith.constant 4.471500e-02 : f32
    %15 = vector.broadcast %cst_10 : f32 to vector<16x64xf32>
    %16 = arith.mulf %15, %14 : vector<16x64xf32>
    %17 = arith.addf %12, %16 : vector<16x64xf32>
    %cst_11 = arith.constant 0.797884583 : f32
    %18 = vector.broadcast %cst_11 : f32 to vector<16x64xf32>
    %19 = arith.mulf %18, %17 : vector<16x64xf32>
    %20 = math.tanh %19 : vector<16x64xf32>
    %cst_12 = arith.constant 1.000000e+00 : f32
    %21 = vector.broadcast %cst_12 : f32 to vector<16x64xf32>
    %22 = arith.addf %21, %20 : vector<16x64xf32>
    %cst_13 = arith.constant 5.000000e-01 : f32
    %23 = vector.broadcast %cst_13 : f32 to vector<16x64xf32>
    %24 = arith.mulf %23, %22 : vector<16x64xf32>
    %25 = arith.mulf %12, %24 : vector<16x64xf32>
    %26 = arith.truncf %25 : vector<16x64xf32> to vector<16x64xbf16>
    %c0_14 = arith.constant 0 : index
    %c0_15 = arith.constant 0 : index
    %27 = vector.load %arg6[%c0_14, %c0_15] : memref<64x32xbf16, #tpu.memory_space<vmem>>, vector<64x32xbf16>
    %cst_16 = arith.constant dense<0.000000e+00> : vector<16x32xf32>
    %28 = tpu.matmul %26, %27, %cst_16 {dimension_numbers = #tpu.dot_dimension_numbers<[1], [0], [0], [1], [0, 0, 1, 1], [], []>} : vector<16x64xbf16>, vector<64x32xbf16>, vector<16x32xf32> -> vector<16x32xf32>
    %c0_17 = arith.constant 0 : index
    %c0_18 = arith.constant 0 : index
    %29 = vector.load %arg7[%c0_17, %c0_18] : memref<1x32xf32, #tpu.memory_space<vmem>>, vector<1x32xf32>
    %30 = vector.broadcast %29 : vector<1x32xf32> to vector<16x32xf32>
    %31 = arith.addf %28, %30 : vector<16x32xf32>
    %32 = arith.truncf %31 : vector<16x32xf32> to vector<16x32xbf16>
    %c0_19 = arith.constant 0 : index
    %c0_20 = arith.constant 0 : index
    %33 = vector.load %arg8[%c0_19, %c0_20] : memref<16x32xbf16, #tpu.memory_space<vmem>>, vector<16x32xbf16>
    tpu.vector_store %arg8[%c0_19, %c0_20], %32 {strides = array<i32>} : memref<16x32xbf16, #tpu.memory_space<vmem>>, vector<16x32xbf16>,
    return
  }
  func.func @transform_0(%arg0: i32) -> (i32, i32) {
    %c0_i32 = arith.constant 0 : i32
    %c0_i32_0 = arith.constant 0 : i32
    return %arg0, %c0_i32 : i32, i32
  }
  func.func @transform_1(%arg0: i32) -> (i32, i32) {
    %c0_i32 = arith.constant 0 : i32
    %c0_i32_0 = arith.constant 0 : i32
    %c0_i32_1 = arith.constant 0 : i32
    return %c0_i32, %c0_i32_0 : i32, i32
  }
  func.func @transform_2(%arg0: i32) -> (i32, i32) {
    %c0_i32 = arith.constant 0 : i32
    %c0_i32_0 = arith.constant 0 : i32
    %c0_i32_1 = arith.constant 0 : i32
    return %c0_i32, %c0_i32_0 : i32, i32
  }
  func.func @transform_3(%arg0: i32) -> (i32, i32) {
    %c0_i32 = arith.constant 0 : i32
    %c0_i32_0 = arith.constant 0 : i32
    %c0_i32_1 = arith.constant 0 : i32
    return %c0_i32, %c0_i32_0 : i32, i32
  }
  func.func @transform_4(%arg0: i32) -> (i32, i32) {
    %c0_i32 = arith.constant 0 : i32
    %c0_i32_0 = arith.constant 0 : i32
    %c0_i32_1 = arith.constant 0 : i32
    return %c0_i32, %c0_i32_0 : i32, i32
  }
  func.func @transform_5(%arg0: i32) -> (i32, i32) {
    %c0_i32 = arith.constant 0 : i32
    %c0_i32_0 = arith.constant 0 : i32
    %c0_i32_1 = arith.constant 0 : i32
    return %c0_i32, %c0_i32_0 : i32, i32
  }
  func.func @transform_6(%arg0: i32) -> (i32, i32) {
    %c0_i32 = arith.constant 0 : i32
    %c0_i32_0 = arith.constant 0 : i32
    %c0_i32_1 = arith.constant 0 : i32
    return %c0_i32, %c0_i32_0 : i32, i32
  }
  func.func @transform_7(%arg0: i32) -> (i32, i32) {
    %c0_i32 = arith.constant 0 : i32
    %c0_i32_0 = arith.constant 0 : i32
    return %arg0, %c0_i32 : i32, i32
  }
}

module attributes {stable_mosaic.version = 11 : i64} {
  func.func @_transformer_stack_kernel(%arg0: i32, %arg1: i32, %arg2: memref<1x8x32xbf16, #tpu.memory_space<vmem>>, %arg3: memref<1x1x32xf32, #tpu.memory_space<vmem>>, %arg4: memref<1x1x32xf32, #tpu.memory_space<vmem>>, %arg5: memref<1x32x96xbf16, #tpu.memory_space<vmem>>, %arg6: memref<1x32x32xbf16, #tpu.memory_space<vmem>>, %arg7: memref<1x1x32xf32, #tpu.memory_space<vmem>>, %arg8: memref<1x1x32xf32, #tpu.memory_space<vmem>>, %arg9: memref<1x1x32xf32, #tpu.memory_space<vmem>>, %arg10: memref<1x32x64xbf16, #tpu.memory_space<vmem>>, %arg11: memref<1x1x64xf32, #tpu.memory_space<vmem>>, %arg12: memref<1x64x32xbf16, #tpu.memory_space<vmem>>, %arg13: memref<1x1x32xf32, #tpu.memory_space<vmem>>, %arg14: memref<1x8x32xbf16, #tpu.memory_space<vmem>>, %arg15: memref<1x8x32xf32, #tpu.memory_space<vmem>>) attributes {dimension_semantics = [#tpu.dimension_semantics<parallel>, #tpu.dimension_semantics<arbitrary>], iteration_bounds = array<i64: 2, 2>, scalar_prefetch = 0 : i64, scratch_operands = 1 : i64, tpu.core_type = #tpu.core_type<tc>, window_params = [{transform_indices = @transform_0, window_bounds = array<i64: 1, 8, 32>}, {transform_indices = @transform_1, window_bounds = array<i64: 1, 1, 32>}, {transform_indices = @transform_2, window_bounds = array<i64: 1, 1, 32>}, {transform_indices = @transform_3, window_bounds = array<i64: 1, 32, 96>}, {transform_indices = @transform_4, window_bounds = array<i64: 1, 32, 32>}, {transform_indices = @transform_5, window_bounds = array<i64: 1, 1, 32>}, {transform_indices = @transform_6, window_bounds = array<i64: 1, 1, 32>}, {transform_indices = @transform_7, window_bounds = array<i64: 1, 1, 32>}, {transform_indices = @transform_8, window_bounds = array<i64: 1, 32, 64>}, {transform_indices = @transform_9, window_bounds = array<i64: 1, 1, 64>}, {transform_indices = @transform_10, window_bounds = array<i64: 1, 64, 32>}, {transform_indices = @transform_11, window_bounds = array<i64: 1, 1, 32>}, {transform_indices = @transform_12, window_bounds = array<i64: 1, 8, 32>}]} {
    %c0_i32 = arith.constant 0 : i32
    %0 = arith.cmpi eq, %arg1, %c0_i32 : i32
    %1 = arith.extui %0 : i1 to i32
    %c0_i32_0 = arith.constant 0 : i32
    %2 = arith.cmpi ne, %1, %c0_i32_0 : i32
    scf.if %2 {
      %c0_73 = arith.constant 0 : index
      %c0_74 = arith.constant 0 : index
      %c0_75 = arith.constant 0 : index
      %182 = vector.load %arg2[%c0_73, %c0_74, %c0_75] : memref<1x8x32xbf16, #tpu.memory_space<vmem>>, vector<1x8x32xbf16>
      %183 = arith.extf %182 : vector<1x8x32xbf16> to vector<1x8x32xf32>
      %c0_76 = arith.constant 0 : index
      %c0_77 = arith.constant 0 : index
      %c0_78 = arith.constant 0 : index
      %184 = vector.load %arg15[%c0_76, %c0_77, %c0_78] : memref<1x8x32xf32, #tpu.memory_space<vmem>>, vector<1x8x32xf32>
      tpu.vector_store %arg15[%c0_76, %c0_77, %c0_78], %183 {strides = array<i32>} : memref<1x8x32xf32, #tpu.memory_space<vmem>>, vector<1x8x32xf32>,
    } else {
    }
    %c0 = arith.constant 0 : index
    %c0_1 = arith.constant 0 : index
    %c0_2 = arith.constant 0 : index
    %3 = vector.load %arg15[%c0, %c0_1, %c0_2] : memref<1x8x32xf32, #tpu.memory_space<vmem>>, vector<1x8x32xf32>
    %4 = vector.shape_cast %3 : vector<1x8x32xf32> to vector<8x32xf32>
    %cst = arith.constant dense<0.000000e+00> : vector<8xf32>
    %5 = vector.multi_reduction <add>, %4, %cst [1] : vector<8x32xf32> to vector<8xf32>
    %6 = vector.shape_cast %5 : vector<8xf32> to vector<8x1xf32>
    %cst_3 = arith.constant 3.200000e+01 : f32
    %7 = vector.broadcast %cst_3 : f32 to vector<8x1xf32>
    %8 = arith.divf %6, %7 : vector<8x1xf32>
    %9 = vector.broadcast %8 : vector<8x1xf32> to vector<8x32xf32>
    %10 = arith.subf %4, %9 : vector<8x32xf32>
    %11 = arith.mulf %10, %10 : vector<8x32xf32>
    %cst_4 = arith.constant dense<0.000000e+00> : vector<8xf32>
    %12 = vector.multi_reduction <add>, %11, %cst_4 [1] : vector<8x32xf32> to vector<8xf32>
    %13 = vector.shape_cast %12 : vector<8xf32> to vector<8x1xf32>
    %cst_5 = arith.constant 3.200000e+01 : f32
    %14 = vector.broadcast %cst_5 : f32 to vector<8x1xf32>
    %15 = arith.divf %13, %14 : vector<8x1xf32>
    %16 = vector.broadcast %8 : vector<8x1xf32> to vector<8x32xf32>
    %17 = arith.subf %4, %16 : vector<8x32xf32>
    %cst_6 = arith.constant 9.99999974E-6 : f32
    %18 = vector.broadcast %cst_6 : f32 to vector<8x1xf32>
    %19 = arith.addf %15, %18 : vector<8x1xf32>
    %20 = math.rsqrt %19 : vector<8x1xf32>
    %21 = vector.broadcast %20 : vector<8x1xf32> to vector<8x32xf32>
    %22 = arith.mulf %17, %21 : vector<8x32xf32>
    %c0_7 = arith.constant 0 : index
    %c0_8 = arith.constant 0 : index
    %c0_9 = arith.constant 0 : index
    %23 = vector.load %arg3[%c0_7, %c0_8, %c0_9] : memref<1x1x32xf32, #tpu.memory_space<vmem>>, vector<1x1x32xf32>
    %24 = vector.shape_cast %23 : vector<1x1x32xf32> to vector<1x32xf32>
    %25 = vector.broadcast %24 : vector<1x32xf32> to vector<8x32xf32>
    %26 = arith.mulf %22, %25 : vector<8x32xf32>
    %c0_10 = arith.constant 0 : index
    %c0_11 = arith.constant 0 : index
    %c0_12 = arith.constant 0 : index
    %27 = vector.load %arg4[%c0_10, %c0_11, %c0_12] : memref<1x1x32xf32, #tpu.memory_space<vmem>>, vector<1x1x32xf32>
    %28 = vector.shape_cast %27 : vector<1x1x32xf32> to vector<1x32xf32>
    %29 = vector.broadcast %28 : vector<1x32xf32> to vector<8x32xf32>
    %30 = arith.addf %26, %29 : vector<8x32xf32>
    %31 = arith.truncf %30 : vector<8x32xf32> to vector<8x32xbf16>
    %c0_13 = arith.constant 0 : index
    %c0_14 = arith.constant 0 : index
    %c0_15 = arith.constant 0 : index
    %32 = vector.load %arg5[%c0_13, %c0_14, %c0_15] : memref<1x32x96xbf16, #tpu.memory_space<vmem>>, vector<1x32x96xbf16>
    %33 = vector.shape_cast %32 : vector<1x32x96xbf16> to vector<32x96xbf16>
    %cst_16 = arith.constant dense<0.000000e+00> : vector<8x96xf32>
    %34 = tpu.matmul %31, %33, %cst_16 {dimension_numbers = #tpu.dot_dimension_numbers<[1], [0], [0], [1], [0, 0, 1, 1], [], []>} : vector<8x32xbf16>, vector<32x96xbf16>, vector<8x96xf32> -> vector<8x96xf32>
    %35 = vector.extract_strided_slice %34 {offsets = [0, 0], sizes = [8, 8], strides = [1, 1]} : vector<8x96xf32> to vector<8x8xf32>
    %36 = vector.shape_cast %35 : vector<8x8xf32> to vector<1x8x8xf32>
    %37 = vector.extract_strided_slice %34 {offsets = [0, 32], sizes = [8, 8], strides = [1, 1]} : vector<8x96xf32> to vector<8x8xf32>
    %38 = vector.shape_cast %37 : vector<8x8xf32> to vector<1x8x8xf32>
    %39 = vector.extract_strided_slice %34 {offsets = [0, 64], sizes = [8, 8], strides = [1, 1]} : vector<8x96xf32> to vector<8x8xf32>
    %40 = vector.shape_cast %39 : vector<8x8xf32> to vector<1x8x8xf32>
    "tpu.trace_start"() <{level = 10 : i32, message = "bqd,bkd->bqk"}> : () -> ()
    %cst_17 = arith.constant dense<0.000000e+00> : vector<1x8x8xf32>
    %41 = tpu.matmul %36, %38, %cst_17 {dimension_numbers = #tpu.dot_dimension_numbers<[2], [2], [1], [1], [0, 0, 0, 1, 1, 1], [0], [0]>} : vector<1x8x8xf32>, vector<1x8x8xf32>, vector<1x8x8xf32> -> vector<1x8x8xf32>
    "tpu.trace_stop"() : () -> ()
    %cst_18 = arith.constant dense<0xFF800000> : vector<1x8xf32>
    %42 = vector.multi_reduction <maximumf>, %41, %cst_18 [2] : vector<1x8x8xf32> to vector<1x8xf32>
    %43 = vector.shape_cast %42 : vector<1x8xf32> to vector<1x8x1xf32>
    %44 = vector.broadcast %43 : vector<1x8x1xf32> to vector<1x8x8xf32>
    %45 = arith.subf %41, %44 : vector<1x8x8xf32>
    %46 = math.exp %45 : vector<1x8x8xf32>
    %cst_19 = arith.constant dense<0.000000e+00> : vector<1x8xf32>
    %47 = vector.multi_reduction <add>, %46, %cst_19 [2] : vector<1x8x8xf32> to vector<1x8xf32>
    %48 = vector.shape_cast %47 : vector<1x8xf32> to vector<1x8x1xf32>
    %49 = tpu.reciprocal %48 {approx = true} : vector<1x8x1xf32> -> vector<1x8x1xf32>
    %50 = vector.broadcast %49 : vector<1x8x1xf32> to vector<1x8x8xf32>
    %51 = arith.mulf %46, %50 : vector<1x8x8xf32>
    "tpu.trace_start"() <{level = 10 : i32, message = "bqk,bkd->bqd"}> : () -> ()
    %cst_20 = arith.constant dense<0.000000e+00> : vector<1x8x8xf32>
    %52 = tpu.matmul %51, %40, %cst_20 {dimension_numbers = #tpu.dot_dimension_numbers<[2], [1], [1], [2], [0, 0, 0, 1, 1, 2], [0], [0]>} : vector<1x8x8xf32>, vector<1x8x8xf32>, vector<1x8x8xf32> -> vector<1x8x8xf32>
    "tpu.trace_stop"() : () -> ()
    %53 = vector.shape_cast %52 : vector<1x8x8xf32> to vector<8x8xf32>
    %54 = vector.extract_strided_slice %34 {offsets = [0, 8], sizes = [8, 8], strides = [1, 1]} : vector<8x96xf32> to vector<8x8xf32>
    %55 = vector.shape_cast %54 : vector<8x8xf32> to vector<1x8x8xf32>
    %56 = vector.extract_strided_slice %34 {offsets = [0, 40], sizes = [8, 8], strides = [1, 1]} : vector<8x96xf32> to vector<8x8xf32>
    %57 = vector.shape_cast %56 : vector<8x8xf32> to vector<1x8x8xf32>
    %58 = vector.extract_strided_slice %34 {offsets = [0, 72], sizes = [8, 8], strides = [1, 1]} : vector<8x96xf32> to vector<8x8xf32>
    %59 = vector.shape_cast %58 : vector<8x8xf32> to vector<1x8x8xf32>
    "tpu.trace_start"() <{level = 10 : i32, message = "bqd,bkd->bqk"}> : () -> ()
    %cst_21 = arith.constant dense<0.000000e+00> : vector<1x8x8xf32>
    %60 = tpu.matmul %55, %57, %cst_21 {dimension_numbers = #tpu.dot_dimension_numbers<[2], [2], [1], [1], [0, 0, 0, 1, 1, 1], [0], [0]>} : vector<1x8x8xf32>, vector<1x8x8xf32>, vector<1x8x8xf32> -> vector<1x8x8xf32>
    "tpu.trace_stop"() : () -> ()
    %cst_22 = arith.constant dense<0xFF800000> : vector<1x8xf32>
    %61 = vector.multi_reduction <maximumf>, %60, %cst_22 [2] : vector<1x8x8xf32> to vector<1x8xf32>
    %62 = vector.shape_cast %61 : vector<1x8xf32> to vector<1x8x1xf32>
    %63 = vector.broadcast %62 : vector<1x8x1xf32> to vector<1x8x8xf32>
    %64 = arith.subf %60, %63 : vector<1x8x8xf32>
    %65 = math.exp %64 : vector<1x8x8xf32>
    %cst_23 = arith.constant dense<0.000000e+00> : vector<1x8xf32>
    %66 = vector.multi_reduction <add>, %65, %cst_23 [2] : vector<1x8x8xf32> to vector<1x8xf32>
    %67 = vector.shape_cast %66 : vector<1x8xf32> to vector<1x8x1xf32>
    %68 = tpu.reciprocal %67 {approx = true} : vector<1x8x1xf32> -> vector<1x8x1xf32>
    %69 = vector.broadcast %68 : vector<1x8x1xf32> to vector<1x8x8xf32>
    %70 = arith.mulf %65, %69 : vector<1x8x8xf32>
    "tpu.trace_start"() <{level = 10 : i32, message = "bqk,bkd->bqd"}> : () -> ()
    %cst_24 = arith.constant dense<0.000000e+00> : vector<1x8x8xf32>
    %71 = tpu.matmul %70, %59, %cst_24 {dimension_numbers = #tpu.dot_dimension_numbers<[2], [1], [1], [2], [0, 0, 0, 1, 1, 2], [0], [0]>} : vector<1x8x8xf32>, vector<1x8x8xf32>, vector<1x8x8xf32> -> vector<1x8x8xf32>
    "tpu.trace_stop"() : () -> ()
    %72 = vector.shape_cast %71 : vector<1x8x8xf32> to vector<8x8xf32>
    %73 = vector.extract_strided_slice %34 {offsets = [0, 16], sizes = [8, 8], strides = [1, 1]} : vector<8x96xf32> to vector<8x8xf32>
    %74 = vector.shape_cast %73 : vector<8x8xf32> to vector<1x8x8xf32>
    %75 = vector.extract_strided_slice %34 {offsets = [0, 48], sizes = [8, 8], strides = [1, 1]} : vector<8x96xf32> to vector<8x8xf32>
    %76 = vector.shape_cast %75 : vector<8x8xf32> to vector<1x8x8xf32>
    %77 = vector.extract_strided_slice %34 {offsets = [0, 80], sizes = [8, 8], strides = [1, 1]} : vector<8x96xf32> to vector<8x8xf32>
    %78 = vector.shape_cast %77 : vector<8x8xf32> to vector<1x8x8xf32>
    "tpu.trace_start"() <{level = 10 : i32, message = "bqd,bkd->bqk"}> : () -> ()
    %cst_25 = arith.constant dense<0.000000e+00> : vector<1x8x8xf32>
    %79 = tpu.matmul %74, %76, %cst_25 {dimension_numbers = #tpu.dot_dimension_numbers<[2], [2], [1], [1], [0, 0, 0, 1, 1, 1], [0], [0]>} : vector<1x8x8xf32>, vector<1x8x8xf32>, vector<1x8x8xf32> -> vector<1x8x8xf32>
    "tpu.trace_stop"() : () -> ()
    %cst_26 = arith.constant dense<0xFF800000> : vector<1x8xf32>
    %80 = vector.multi_reduction <maximumf>, %79, %cst_26 [2] : vector<1x8x8xf32> to vector<1x8xf32>
    %81 = vector.shape_cast %80 : vector<1x8xf32> to vector<1x8x1xf32>
    %82 = vector.broadcast %81 : vector<1x8x1xf32> to vector<1x8x8xf32>
    %83 = arith.subf %79, %82 : vector<1x8x8xf32>
    %84 = math.exp %83 : vector<1x8x8xf32>
    %cst_27 = arith.constant dense<0.000000e+00> : vector<1x8xf32>
    %85 = vector.multi_reduction <add>, %84, %cst_27 [2] : vector<1x8x8xf32> to vector<1x8xf32>
    %86 = vector.shape_cast %85 : vector<1x8xf32> to vector<1x8x1xf32>
    %87 = tpu.reciprocal %86 {approx = true} : vector<1x8x1xf32> -> vector<1x8x1xf32>
    %88 = vector.broadcast %87 : vector<1x8x1xf32> to vector<1x8x8xf32>
    %89 = arith.mulf %84, %88 : vector<1x8x8xf32>
    "tpu.trace_start"() <{level = 10 : i32, message = "bqk,bkd->bqd"}> : () -> ()
    %cst_28 = arith.constant dense<0.000000e+00> : vector<1x8x8xf32>
    %90 = tpu.matmul %89, %78, %cst_28 {dimension_numbers = #tpu.dot_dimension_numbers<[2], [1], [1], [2], [0, 0, 0, 1, 1, 2], [0], [0]>} : vector<1x8x8xf32>, vector<1x8x8xf32>, vector<1x8x8xf32> -> vector<1x8x8xf32>
    "tpu.trace_stop"() : () -> ()
    %91 = vector.shape_cast %90 : vector<1x8x8xf32> to vector<8x8xf32>
    %92 = vector.extract_strided_slice %34 {offsets = [0, 24], sizes = [8, 8], strides = [1, 1]} : vector<8x96xf32> to vector<8x8xf32>
    %93 = vector.shape_cast %92 : vector<8x8xf32> to vector<1x8x8xf32>
    %94 = vector.extract_strided_slice %34 {offsets = [0, 56], sizes = [8, 8], strides = [1, 1]} : vector<8x96xf32> to vector<8x8xf32>
    %95 = vector.shape_cast %94 : vector<8x8xf32> to vector<1x8x8xf32>
    %96 = vector.extract_strided_slice %34 {offsets = [0, 88], sizes = [8, 8], strides = [1, 1]} : vector<8x96xf32> to vector<8x8xf32>
    %97 = vector.shape_cast %96 : vector<8x8xf32> to vector<1x8x8xf32>
    "tpu.trace_start"() <{level = 10 : i32, message = "bqd,bkd->bqk"}> : () -> ()
    %cst_29 = arith.constant dense<0.000000e+00> : vector<1x8x8xf32>
    %98 = tpu.matmul %93, %95, %cst_29 {dimension_numbers = #tpu.dot_dimension_numbers<[2], [2], [1], [1], [0, 0, 0, 1, 1, 1], [0], [0]>} : vector<1x8x8xf32>, vector<1x8x8xf32>, vector<1x8x8xf32> -> vector<1x8x8xf32>
    "tpu.trace_stop"() : () -> ()
    %cst_30 = arith.constant dense<0xFF800000> : vector<1x8xf32>
    %99 = vector.multi_reduction <maximumf>, %98, %cst_30 [2] : vector<1x8x8xf32> to vector<1x8xf32>
    %100 = vector.shape_cast %99 : vector<1x8xf32> to vector<1x8x1xf32>
    %101 = vector.broadcast %100 : vector<1x8x1xf32> to vector<1x8x8xf32>
    %102 = arith.subf %98, %101 : vector<1x8x8xf32>
    %103 = math.exp %102 : vector<1x8x8xf32>
    %cst_31 = arith.constant dense<0.000000e+00> : vector<1x8xf32>
    %104 = vector.multi_reduction <add>, %103, %cst_31 [2] : vector<1x8x8xf32> to vector<1x8xf32>
    %105 = vector.shape_cast %104 : vector<1x8xf32> to vector<1x8x1xf32>
    %106 = tpu.reciprocal %105 {approx = true} : vector<1x8x1xf32> -> vector<1x8x1xf32>
    %107 = vector.broadcast %106 : vector<1x8x1xf32> to vector<1x8x8xf32>
    %108 = arith.mulf %103, %107 : vector<1x8x8xf32>
    "tpu.trace_start"() <{level = 10 : i32, message = "bqk,bkd->bqd"}> : () -> ()
    %cst_32 = arith.constant dense<0.000000e+00> : vector<1x8x8xf32>
    %109 = tpu.matmul %108, %97, %cst_32 {dimension_numbers = #tpu.dot_dimension_numbers<[2], [1], [1], [2], [0, 0, 0, 1, 1, 2], [0], [0]>} : vector<1x8x8xf32>, vector<1x8x8xf32>, vector<1x8x8xf32> -> vector<1x8x8xf32>
    "tpu.trace_stop"() : () -> ()
    %110 = vector.shape_cast %109 : vector<1x8x8xf32> to vector<8x8xf32>
    %111 = tpu.concatenate %53, %72, %91, %110 in 1 : vector<8x8xf32>, vector<8x8xf32>, vector<8x8xf32>, vector<8x8xf32> -> vector<8x32xf32>
    %112 = arith.truncf %111 : vector<8x32xf32> to vector<8x32xbf16>
    %c0_33 = arith.constant 0 : index
    %c0_34 = arith.constant 0 : index
    %c0_35 = arith.constant 0 : index
    %113 = vector.load %arg6[%c0_33, %c0_34, %c0_35] : memref<1x32x32xbf16, #tpu.memory_space<vmem>>, vector<1x32x32xbf16>
    %114 = vector.shape_cast %113 : vector<1x32x32xbf16> to vector<32x32xbf16>
    %cst_36 = arith.constant dense<0.000000e+00> : vector<8x32xf32>
    %115 = tpu.matmul %112, %114, %cst_36 {dimension_numbers = #tpu.dot_dimension_numbers<[1], [0], [0], [1], [0, 0, 1, 1], [], []>} : vector<8x32xbf16>, vector<32x32xbf16>, vector<8x32xf32> -> vector<8x32xf32>
    %116 = arith.addf %4, %115 : vector<8x32xf32>
    %c0_37 = arith.constant 0 : index
    %c0_38 = arith.constant 0 : index
    %c0_39 = arith.constant 0 : index
    %117 = vector.load %arg7[%c0_37, %c0_38, %c0_39] : memref<1x1x32xf32, #tpu.memory_space<vmem>>, vector<1x1x32xf32>
    %118 = vector.shape_cast %117 : vector<1x1x32xf32> to vector<1x32xf32>
    %119 = vector.broadcast %118 : vector<1x32xf32> to vector<8x32xf32>
    %120 = arith.addf %116, %119 : vector<8x32xf32>
    %cst_40 = arith.constant dense<0.000000e+00> : vector<8xf32>
    %121 = vector.multi_reduction <add>, %120, %cst_40 [1] : vector<8x32xf32> to vector<8xf32>
    %122 = vector.shape_cast %121 : vector<8xf32> to vector<8x1xf32>
    %cst_41 = arith.constant 3.200000e+01 : f32
    %123 = vector.broadcast %cst_41 : f32 to vector<8x1xf32>
    %124 = arith.divf %122, %123 : vector<8x1xf32>
    %125 = vector.broadcast %124 : vector<8x1xf32> to vector<8x32xf32>
    %126 = arith.subf %120, %125 : vector<8x32xf32>
    %127 = arith.mulf %126, %126 : vector<8x32xf32>
    %cst_42 = arith.constant dense<0.000000e+00> : vector<8xf32>
    %128 = vector.multi_reduction <add>, %127, %cst_42 [1] : vector<8x32xf32> to vector<8xf32>
    %129 = vector.shape_cast %128 : vector<8xf32> to vector<8x1xf32>
    %cst_43 = arith.constant 3.200000e+01 : f32
    %130 = vector.broadcast %cst_43 : f32 to vector<8x1xf32>
    %131 = arith.divf %129, %130 : vector<8x1xf32>
    %132 = vector.broadcast %124 : vector<8x1xf32> to vector<8x32xf32>
    %133 = arith.subf %120, %132 : vector<8x32xf32>
    %cst_44 = arith.constant 9.99999974E-6 : f32
    %134 = vector.broadcast %cst_44 : f32 to vector<8x1xf32>
    %135 = arith.addf %131, %134 : vector<8x1xf32>
    %136 = math.rsqrt %135 : vector<8x1xf32>
    %137 = vector.broadcast %136 : vector<8x1xf32> to vector<8x32xf32>
    %138 = arith.mulf %133, %137 : vector<8x32xf32>
    %c0_45 = arith.constant 0 : index
    %c0_46 = arith.constant 0 : index
    %c0_47 = arith.constant 0 : index
    %139 = vector.load %arg8[%c0_45, %c0_46, %c0_47] : memref<1x1x32xf32, #tpu.memory_space<vmem>>, vector<1x1x32xf32>
    %140 = vector.shape_cast %139 : vector<1x1x32xf32> to vector<1x32xf32>
    %141 = vector.broadcast %140 : vector<1x32xf32> to vector<8x32xf32>
    %142 = arith.mulf %138, %141 : vector<8x32xf32>
    %c0_48 = arith.constant 0 : index
    %c0_49 = arith.constant 0 : index
    %c0_50 = arith.constant 0 : index
    %143 = vector.load %arg9[%c0_48, %c0_49, %c0_50] : memref<1x1x32xf32, #tpu.memory_space<vmem>>, vector<1x1x32xf32>
    %144 = vector.shape_cast %143 : vector<1x1x32xf32> to vector<1x32xf32>
    %145 = vector.broadcast %144 : vector<1x32xf32> to vector<8x32xf32>
    %146 = arith.addf %142, %145 : vector<8x32xf32>
    %147 = arith.truncf %146 : vector<8x32xf32> to vector<8x32xbf16>
    %c0_51 = arith.constant 0 : index
    %c0_52 = arith.constant 0 : index
    %c0_53 = arith.constant 0 : index
    %148 = vector.load %arg10[%c0_51, %c0_52, %c0_53] : memref<1x32x64xbf16, #tpu.memory_space<vmem>>, vector<1x32x64xbf16>
    %149 = vector.shape_cast %148 : vector<1x32x64xbf16> to vector<32x64xbf16>
    %cst_54 = arith.constant dense<0.000000e+00> : vector<8x64xf32>
    %150 = tpu.matmul %147, %149, %cst_54 {dimension_numbers = #tpu.dot_dimension_numbers<[1], [0], [0], [1], [0, 0, 1, 1], [], []>} : vector<8x32xbf16>, vector<32x64xbf16>, vector<8x64xf32> -> vector<8x64xf32>
    %c0_55 = arith.constant 0 : index
    %c0_56 = arith.constant 0 : index
    %c0_57 = arith.constant 0 : index
    %151 = vector.load %arg11[%c0_55, %c0_56, %c0_57] : memref<1x1x64xf32, #tpu.memory_space<vmem>>, vector<1x1x64xf32>
    %152 = vector.shape_cast %151 : vector<1x1x64xf32> to vector<1x64xf32>
    %153 = vector.broadcast %152 : vector<1x64xf32> to vector<8x64xf32>
    %154 = arith.addf %150, %153 : vector<8x64xf32>
    %155 = arith.mulf %154, %154 : vector<8x64xf32>
    %156 = arith.mulf %154, %155 : vector<8x64xf32>
    %cst_58 = arith.constant 4.471500e-02 : f32
    %157 = vector.broadcast %cst_58 : f32 to vector<8x64xf32>
    %158 = arith.mulf %157, %156 : vector<8x64xf32>
    %159 = arith.addf %154, %158 : vector<8x64xf32>
    %cst_59 = arith.constant 0.797884583 : f32
    %160 = vector.broadcast %cst_59 : f32 to vector<8x64xf32>
    %161 = arith.mulf %160, %159 : vector<8x64xf32>
    %162 = math.tanh %161 : vector<8x64xf32>
    %cst_60 = arith.constant 1.000000e+00 : f32
    %163 = vector.broadcast %cst_60 : f32 to vector<8x64xf32>
    %164 = arith.addf %163, %162 : vector<8x64xf32>
    %cst_61 = arith.constant 5.000000e-01 : f32
    %165 = vector.broadcast %cst_61 : f32 to vector<8x64xf32>
    %166 = arith.mulf %165, %164 : vector<8x64xf32>
    %167 = arith.mulf %154, %166 : vector<8x64xf32>
    %168 = arith.truncf %167 : vector<8x64xf32> to vector<8x64xbf16>
    %c0_62 = arith.constant 0 : index
    %c0_63 = arith.constant 0 : index
    %c0_64 = arith.constant 0 : index
    %169 = vector.load %arg12[%c0_62, %c0_63, %c0_64] : memref<1x64x32xbf16, #tpu.memory_space<vmem>>, vector<1x64x32xbf16>
    %170 = vector.shape_cast %169 : vector<1x64x32xbf16> to vector<64x32xbf16>
    %cst_65 = arith.constant dense<0.000000e+00> : vector<8x32xf32>
    %171 = tpu.matmul %168, %170, %cst_65 {dimension_numbers = #tpu.dot_dimension_numbers<[1], [0], [0], [1], [0, 0, 1, 1], [], []>} : vector<8x64xbf16>, vector<64x32xbf16>, vector<8x32xf32> -> vector<8x32xf32>
    %172 = arith.addf %120, %171 : vector<8x32xf32>
    %c0_66 = arith.constant 0 : index
    %c0_67 = arith.constant 0 : index
    %c0_68 = arith.constant 0 : index
    %173 = vector.load %arg13[%c0_66, %c0_67, %c0_68] : memref<1x1x32xf32, #tpu.memory_space<vmem>>, vector<1x1x32xf32>
    %174 = vector.shape_cast %173 : vector<1x1x32xf32> to vector<1x32xf32>
    %175 = vector.broadcast %174 : vector<1x32xf32> to vector<8x32xf32>
    %176 = arith.addf %172, %175 : vector<8x32xf32>
    %177 = vector.shape_cast %176 : vector<8x32xf32> to vector<1x8x32xf32>
    %c0_69 = arith.constant 0 : index
    %c0_70 = arith.constant 0 : index
    %c0_71 = arith.constant 0 : index
    %178 = vector.load %arg15[%c0_69, %c0_70, %c0_71] : memref<1x8x32xf32, #tpu.memory_space<vmem>>, vector<1x8x32xf32>
    tpu.vector_store %arg15[%c0_69, %c0_70, %c0_71], %177 {strides = array<i32>} : memref<1x8x32xf32, #tpu.memory_space<vmem>>, vector<1x8x32xf32>,
    %c1_i32 = arith.constant 1 : i32
    %179 = arith.cmpi eq, %arg1, %c1_i32 : i32
    %180 = arith.extui %179 : i1 to i32
    %c0_i32_72 = arith.constant 0 : i32
    %181 = arith.cmpi ne, %180, %c0_i32_72 : i32
    scf.if %181 {
      %c0_73 = arith.constant 0 : index
      %c0_74 = arith.constant 0 : index
      %c0_75 = arith.constant 0 : index
      %182 = vector.load %arg15[%c0_73, %c0_74, %c0_75] : memref<1x8x32xf32, #tpu.memory_space<vmem>>, vector<1x8x32xf32>
      %183 = arith.truncf %182 : vector<1x8x32xf32> to vector<1x8x32xbf16>
      %c0_76 = arith.constant 0 : index
      %c0_77 = arith.constant 0 : index
      %c0_78 = arith.constant 0 : index
      %184 = vector.load %arg14[%c0_76, %c0_77, %c0_78] : memref<1x8x32xbf16, #tpu.memory_space<vmem>>, vector<1x8x32xbf16>
      tpu.vector_store %arg14[%c0_76, %c0_77, %c0_78], %183 {strides = array<i32>} : memref<1x8x32xbf16, #tpu.memory_space<vmem>>, vector<1x8x32xbf16>,
    } else {
    }
    return
  }
  func.func @transform_0(%arg0: i32, %arg1: i32) -> (i32, i32, i32) {
    %c0_i32 = arith.constant 0 : i32
    %c0_i32_0 = arith.constant 0 : i32
    %c0_i32_1 = arith.constant 0 : i32
    return %arg0, %c0_i32, %c0_i32_0 : i32, i32, i32
  }
  func.func @transform_1(%arg0: i32, %arg1: i32) -> (i32, i32, i32) {
    %c0_i32 = arith.constant 0 : i32
    %c0_i32_0 = arith.constant 0 : i32
    %c0_i32_1 = arith.constant 0 : i32
    return %arg1, %c0_i32, %c0_i32_0 : i32, i32, i32
  }
  func.func @transform_2(%arg0: i32, %arg1: i32) -> (i32, i32, i32) {
    %c0_i32 = arith.constant 0 : i32
    %c0_i32_0 = arith.constant 0 : i32
    %c0_i32_1 = arith.constant 0 : i32
    return %arg1, %c0_i32, %c0_i32_0 : i32, i32, i32
  }
  func.func @transform_3(%arg0: i32, %arg1: i32) -> (i32, i32, i32) {
    %c0_i32 = arith.constant 0 : i32
    %c0_i32_0 = arith.constant 0 : i32
    %c0_i32_1 = arith.constant 0 : i32
    return %arg1, %c0_i32, %c0_i32_0 : i32, i32, i32
  }
  func.func @transform_4(%arg0: i32, %arg1: i32) -> (i32, i32, i32) {
    %c0_i32 = arith.constant 0 : i32
    %c0_i32_0 = arith.constant 0 : i32
    %c0_i32_1 = arith.constant 0 : i32
    return %arg1, %c0_i32, %c0_i32_0 : i32, i32, i32
  }
  func.func @transform_5(%arg0: i32, %arg1: i32) -> (i32, i32, i32) {
    %c0_i32 = arith.constant 0 : i32
    %c0_i32_0 = arith.constant 0 : i32
    %c0_i32_1 = arith.constant 0 : i32
    return %arg1, %c0_i32, %c0_i32_0 : i32, i32, i32
  }
  func.func @transform_6(%arg0: i32, %arg1: i32) -> (i32, i32, i32) {
    %c0_i32 = arith.constant 0 : i32
    %c0_i32_0 = arith.constant 0 : i32
    %c0_i32_1 = arith.constant 0 : i32
    return %arg1, %c0_i32, %c0_i32_0 : i32, i32, i32
  }
  func.func @transform_7(%arg0: i32, %arg1: i32) -> (i32, i32, i32) {
    %c0_i32 = arith.constant 0 : i32
    %c0_i32_0 = arith.constant 0 : i32
    %c0_i32_1 = arith.constant 0 : i32
    return %arg1, %c0_i32, %c0_i32_0 : i32, i32, i32
  }
  func.func @transform_8(%arg0: i32, %arg1: i32) -> (i32, i32, i32) {
    %c0_i32 = arith.constant 0 : i32
    %c0_i32_0 = arith.constant 0 : i32
    %c0_i32_1 = arith.constant 0 : i32
    return %arg1, %c0_i32, %c0_i32_0 : i32, i32, i32
  }
  func.func @transform_9(%arg0: i32, %arg1: i32) -> (i32, i32, i32) {
    %c0_i32 = arith.constant 0 : i32
    %c0_i32_0 = arith.constant 0 : i32
    %c0_i32_1 = arith.constant 0 : i32
    return %arg1, %c0_i32, %c0_i32_0 : i32, i32, i32
  }
  func.func @transform_10(%arg0: i32, %arg1: i32) -> (i32, i32, i32) {
    %c0_i32 = arith.constant 0 : i32
    %c0_i32_0 = arith.constant 0 : i32
    %c0_i32_1 = arith.constant 0 : i32
    return %arg1, %c0_i32, %c0_i32_0 : i32, i32, i32
  }
  func.func @transform_11(%arg0: i32, %arg1: i32) -> (i32, i32, i32) {
    %c0_i32 = arith.constant 0 : i32
    %c0_i32_0 = arith.constant 0 : i32
    %c0_i32_1 = arith.constant 0 : i32
    return %arg1, %c0_i32, %c0_i32_0 : i32, i32, i32
  }
  func.func @transform_12(%arg0: i32, %arg1: i32) -> (i32, i32, i32) {
    %c0_i32 = arith.constant 0 : i32
    %c0_i32_0 = arith.constant 0 : i32
    %c0_i32_1 = arith.constant 0 : i32
    return %arg0, %c0_i32, %c0_i32_0 : i32, i32, i32
  }
}

module attributes {stable_mosaic.version = 11 : i64} {
  func.func @_ln_linear_kernel(%arg0: i32, %arg1: memref<16x32xbf16, #tpu.memory_space<vmem>>, %arg2: memref<1x32xf32, #tpu.memory_space<vmem>>, %arg3: memref<1x32xf32, #tpu.memory_space<vmem>>, %arg4: memref<32x128xbf16, #tpu.memory_space<vmem>>, %arg5: memref<1x128xf32, #tpu.memory_space<vmem>>, %arg6: memref<16x128xf32, #tpu.memory_space<vmem>>) attributes {dimension_semantics = [#tpu.dimension_semantics<parallel>], iteration_bounds = array<i64: 1>, scalar_prefetch = 0 : i64, scratch_operands = 0 : i64, tpu.core_type = #tpu.core_type<tc>, window_params = [{transform_indices = @transform_0, window_bounds = array<i64: 16, 32>}, {pipeline_mode = #tpu.pipeline_mode<synchronous>, transform_indices = @transform_1, window_bounds = array<i64: 1, 32>}, {pipeline_mode = #tpu.pipeline_mode<synchronous>, transform_indices = @transform_2, window_bounds = array<i64: 1, 32>}, {pipeline_mode = #tpu.pipeline_mode<synchronous>, transform_indices = @transform_3, window_bounds = array<i64: 32, 128>}, {pipeline_mode = #tpu.pipeline_mode<synchronous>, transform_indices = @transform_4, window_bounds = array<i64: 1, 128>}, {transform_indices = @transform_5, window_bounds = array<i64: 16, 128>}]} {
    %c0 = arith.constant 0 : index
    %c0_0 = arith.constant 0 : index
    %0 = vector.load %arg1[%c0, %c0_0] : memref<16x32xbf16, #tpu.memory_space<vmem>>, vector<16x32xbf16>
    %1 = arith.extf %0 : vector<16x32xbf16> to vector<16x32xf32>
    %cst = arith.constant dense<0.000000e+00> : vector<16xf32>
    %2 = vector.multi_reduction <add>, %1, %cst [1] : vector<16x32xf32> to vector<16xf32>
    %3 = vector.shape_cast %2 : vector<16xf32> to vector<16x1xf32>
    %cst_1 = arith.constant 3.200000e+01 : f32
    %4 = vector.broadcast %cst_1 : f32 to vector<16x1xf32>
    %5 = arith.divf %3, %4 : vector<16x1xf32>
    %6 = vector.broadcast %5 : vector<16x1xf32> to vector<16x32xf32>
    %7 = arith.subf %1, %6 : vector<16x32xf32>
    %8 = arith.mulf %7, %7 : vector<16x32xf32>
    %cst_2 = arith.constant dense<0.000000e+00> : vector<16xf32>
    %9 = vector.multi_reduction <add>, %8, %cst_2 [1] : vector<16x32xf32> to vector<16xf32>
    %10 = vector.shape_cast %9 : vector<16xf32> to vector<16x1xf32>
    %cst_3 = arith.constant 3.200000e+01 : f32
    %11 = vector.broadcast %cst_3 : f32 to vector<16x1xf32>
    %12 = arith.divf %10, %11 : vector<16x1xf32>
    %13 = vector.broadcast %5 : vector<16x1xf32> to vector<16x32xf32>
    %14 = arith.subf %1, %13 : vector<16x32xf32>
    %cst_4 = arith.constant 9.99999974E-6 : f32
    %15 = vector.broadcast %cst_4 : f32 to vector<16x1xf32>
    %16 = arith.addf %12, %15 : vector<16x1xf32>
    %17 = math.rsqrt %16 : vector<16x1xf32>
    %18 = vector.broadcast %17 : vector<16x1xf32> to vector<16x32xf32>
    %19 = arith.mulf %14, %18 : vector<16x32xf32>
    %c0_5 = arith.constant 0 : index
    %c0_6 = arith.constant 0 : index
    %20 = vector.load %arg2[%c0_5, %c0_6] : memref<1x32xf32, #tpu.memory_space<vmem>>, vector<1x32xf32>
    %21 = vector.broadcast %20 : vector<1x32xf32> to vector<16x32xf32>
    %22 = arith.mulf %19, %21 : vector<16x32xf32>
    %c0_7 = arith.constant 0 : index
    %c0_8 = arith.constant 0 : index
    %23 = vector.load %arg3[%c0_7, %c0_8] : memref<1x32xf32, #tpu.memory_space<vmem>>, vector<1x32xf32>
    %24 = vector.broadcast %23 : vector<1x32xf32> to vector<16x32xf32>
    %25 = arith.addf %22, %24 : vector<16x32xf32>
    %26 = arith.truncf %25 : vector<16x32xf32> to vector<16x32xbf16>
    %c0_9 = arith.constant 0 : index
    %c0_10 = arith.constant 0 : index
    %27 = vector.load %arg4[%c0_9, %c0_10] : memref<32x128xbf16, #tpu.memory_space<vmem>>, vector<32x128xbf16>
    %cst_11 = arith.constant dense<0.000000e+00> : vector<16x128xf32>
    %28 = tpu.matmul %26, %27, %cst_11 {dimension_numbers = #tpu.dot_dimension_numbers<[1], [0], [0], [1], [0, 0, 1, 1], [], []>} : vector<16x32xbf16>, vector<32x128xbf16>, vector<16x128xf32> -> vector<16x128xf32>
    %c0_12 = arith.constant 0 : index
    %c0_13 = arith.constant 0 : index
    %29 = vector.load %arg5[%c0_12, %c0_13] : memref<1x128xf32, #tpu.memory_space<vmem>>, vector<1x128xf32>
    %30 = vector.broadcast %29 : vector<1x128xf32> to vector<16x128xf32>
    %31 = arith.addf %28, %30 : vector<16x128xf32>
    %c0_14 = arith.constant 0 : index
    %c0_15 = arith.constant 0 : index
    %32 = vector.load %arg6[%c0_14, %c0_15] : memref<16x128xf32, #tpu.memory_space<vmem>>, vector<16x128xf32>
    tpu.vector_store %arg6[%c0_14, %c0_15], %31 {strides = array<i32>} : memref<16x128xf32, #tpu.memory_space<vmem>>, vector<16x128xf32>,
    return
  }
  func.func @transform_0(%arg0: i32) -> (i32, i32) {
    %c0_i32 = arith.constant 0 : i32
    %c0_i32_0 = arith.constant 0 : i32
    return %arg0, %c0_i32 : i32, i32
  }
  func.func @transform_1(%arg0: i32) -> (i32, i32) {
    %c0_i32 = arith.constant 0 : i32
    %c0_i32_0 = arith.constant 0 : i32
    %c0_i32_1 = arith.constant 0 : i32
    return %c0_i32, %c0_i32_0 : i32, i32
  }
  func.func @transform_2(%arg0: i32) -> (i32, i32) {
    %c0_i32 = arith.constant 0 : i32
    %c0_i32_0 = arith.constant 0 : i32
    %c0_i32_1 = arith.constant 0 : i32
    return %c0_i32, %c0_i32_0 : i32, i32
  }
  func.func @transform_3(%arg0: i32) -> (i32, i32) {
    %c0_i32 = arith.constant 0 : i32
    %c0_i32_0 = arith.constant 0 : i32
    %c0_i32_1 = arith.constant 0 : i32
    return %c0_i32, %c0_i32_0 : i32, i32
  }
  func.func @transform_4(%arg0: i32) -> (i32, i32) {
    %c0_i32 = arith.constant 0 : i32
    %c0_i32_0 = arith.constant 0 : i32
    %c0_i32_1 = arith.constant 0 : i32
    return %c0_i32, %c0_i32_0 : i32, i32
  }
  func.func @transform_5(%arg0: i32) -> (i32, i32) {
    %c0_i32 = arith.constant 0 : i32
    %c0_i32_0 = arith.constant 0 : i32
    return %arg0, %c0_i32 : i32, i32
  }
}

module attributes {stable_mosaic.version = 11 : i64} {
  func.func @_ln_linear_kernel(%arg0: i32, %arg1: memref<2x32xbf16, #tpu.memory_space<vmem>>, %arg2: memref<1x32xf32, #tpu.memory_space<vmem>>, %arg3: memref<1x32xf32, #tpu.memory_space<vmem>>, %arg4: memref<32x128xbf16, #tpu.memory_space<vmem>>, %arg5: memref<1x128xf32, #tpu.memory_space<vmem>>, %arg6: memref<2x128xf32, #tpu.memory_space<vmem>>) attributes {dimension_semantics = [#tpu.dimension_semantics<parallel>], iteration_bounds = array<i64: 1>, scalar_prefetch = 0 : i64, scratch_operands = 0 : i64, tpu.core_type = #tpu.core_type<tc>, window_params = [{transform_indices = @transform_0, window_bounds = array<i64: 2, 32>}, {pipeline_mode = #tpu.pipeline_mode<synchronous>, transform_indices = @transform_1, window_bounds = array<i64: 1, 32>}, {pipeline_mode = #tpu.pipeline_mode<synchronous>, transform_indices = @transform_2, window_bounds = array<i64: 1, 32>}, {pipeline_mode = #tpu.pipeline_mode<synchronous>, transform_indices = @transform_3, window_bounds = array<i64: 32, 128>}, {pipeline_mode = #tpu.pipeline_mode<synchronous>, transform_indices = @transform_4, window_bounds = array<i64: 1, 128>}, {transform_indices = @transform_5, window_bounds = array<i64: 2, 128>}]} {
    %c0 = arith.constant 0 : index
    %c0_0 = arith.constant 0 : index
    %0 = vector.load %arg1[%c0, %c0_0] : memref<2x32xbf16, #tpu.memory_space<vmem>>, vector<2x32xbf16>
    %1 = arith.extf %0 : vector<2x32xbf16> to vector<2x32xf32>
    %cst = arith.constant dense<0.000000e+00> : vector<2xf32>
    %2 = vector.multi_reduction <add>, %1, %cst [1] : vector<2x32xf32> to vector<2xf32>
    %3 = vector.shape_cast %2 : vector<2xf32> to vector<2x1xf32>
    %cst_1 = arith.constant 3.200000e+01 : f32
    %4 = vector.broadcast %cst_1 : f32 to vector<2x1xf32>
    %5 = arith.divf %3, %4 : vector<2x1xf32>
    %6 = vector.broadcast %5 : vector<2x1xf32> to vector<2x32xf32>
    %7 = arith.subf %1, %6 : vector<2x32xf32>
    %8 = arith.mulf %7, %7 : vector<2x32xf32>
    %cst_2 = arith.constant dense<0.000000e+00> : vector<2xf32>
    %9 = vector.multi_reduction <add>, %8, %cst_2 [1] : vector<2x32xf32> to vector<2xf32>
    %10 = vector.shape_cast %9 : vector<2xf32> to vector<2x1xf32>
    %cst_3 = arith.constant 3.200000e+01 : f32
    %11 = vector.broadcast %cst_3 : f32 to vector<2x1xf32>
    %12 = arith.divf %10, %11 : vector<2x1xf32>
    %13 = vector.broadcast %5 : vector<2x1xf32> to vector<2x32xf32>
    %14 = arith.subf %1, %13 : vector<2x32xf32>
    %cst_4 = arith.constant 9.99999974E-6 : f32
    %15 = vector.broadcast %cst_4 : f32 to vector<2x1xf32>
    %16 = arith.addf %12, %15 : vector<2x1xf32>
    %17 = math.rsqrt %16 : vector<2x1xf32>
    %18 = vector.broadcast %17 : vector<2x1xf32> to vector<2x32xf32>
    %19 = arith.mulf %14, %18 : vector<2x32xf32>
    %c0_5 = arith.constant 0 : index
    %c0_6 = arith.constant 0 : index
    %20 = vector.load %arg2[%c0_5, %c0_6] : memref<1x32xf32, #tpu.memory_space<vmem>>, vector<1x32xf32>
    %21 = vector.broadcast %20 : vector<1x32xf32> to vector<2x32xf32>
    %22 = arith.mulf %19, %21 : vector<2x32xf32>
    %c0_7 = arith.constant 0 : index
    %c0_8 = arith.constant 0 : index
    %23 = vector.load %arg3[%c0_7, %c0_8] : memref<1x32xf32, #tpu.memory_space<vmem>>, vector<1x32xf32>
    %24 = vector.broadcast %23 : vector<1x32xf32> to vector<2x32xf32>
    %25 = arith.addf %22, %24 : vector<2x32xf32>
    %26 = arith.truncf %25 : vector<2x32xf32> to vector<2x32xbf16>
    %c0_9 = arith.constant 0 : index
    %c0_10 = arith.constant 0 : index
    %27 = vector.load %arg4[%c0_9, %c0_10] : memref<32x128xbf16, #tpu.memory_space<vmem>>, vector<32x128xbf16>
    %cst_11 = arith.constant dense<0.000000e+00> : vector<2x128xf32>
    %28 = tpu.matmul %26, %27, %cst_11 {dimension_numbers = #tpu.dot_dimension_numbers<[1], [0], [0], [1], [0, 0, 1, 1], [], []>} : vector<2x32xbf16>, vector<32x128xbf16>, vector<2x128xf32> -> vector<2x128xf32>
    %c0_12 = arith.constant 0 : index
    %c0_13 = arith.constant 0 : index
    %29 = vector.load %arg5[%c0_12, %c0_13] : memref<1x128xf32, #tpu.memory_space<vmem>>, vector<1x128xf32>
    %30 = vector.broadcast %29 : vector<1x128xf32> to vector<2x128xf32>
    %31 = arith.addf %28, %30 : vector<2x128xf32>
    %c0_14 = arith.constant 0 : index
    %c0_15 = arith.constant 0 : index
    %32 = vector.load %arg6[%c0_14, %c0_15] : memref<2x128xf32, #tpu.memory_space<vmem>>, vector<2x128xf32>
    tpu.vector_store %arg6[%c0_14, %c0_15], %31 {strides = array<i32>} : memref<2x128xf32, #tpu.memory_space<vmem>>, vector<2x128xf32>,
    return
  }
  func.func @transform_0(%arg0: i32) -> (i32, i32) {
    %c0_i32 = arith.constant 0 : i32
    %c0_i32_0 = arith.constant 0 : i32
    return %arg0, %c0_i32 : i32, i32
  }
  func.func @transform_1(%arg0: i32) -> (i32, i32) {
    %c0_i32 = arith.constant 0 : i32
    %c0_i32_0 = arith.constant 0 : i32
    %c0_i32_1 = arith.constant 0 : i32
    return %c0_i32, %c0_i32_0 : i32, i32
  }
  func.func @transform_2(%arg0: i32) -> (i32, i32) {
    %c0_i32 = arith.constant 0 : i32
    %c0_i32_0 = arith.constant 0 : i32
    %c0_i32_1 = arith.constant 0 : i32
    return %c0_i32, %c0_i32_0 : i32, i32
  }
  func.func @transform_3(%arg0: i32) -> (i32, i32) {
    %c0_i32 = arith.constant 0 : i32
    %c0_i32_0 = arith.constant 0 : i32
    %c0_i32_1 = arith.constant 0 : i32
    return %c0_i32, %c0_i32_0 : i32, i32
  }
  func.func @transform_4(%arg0: i32) -> (i32, i32) {
    %c0_i32 = arith.constant 0 : i32
    %c0_i32_0 = arith.constant 0 : i32
    %c0_i32_1 = arith.constant 0 : i32
    return %c0_i32, %c0_i32_0 : i32, i32
  }
  func.func @transform_5(%arg0: i32) -> (i32, i32) {
    %c0_i32 = arith.constant 0 : i32
    %c0_i32_0 = arith.constant 0 : i32
    return %arg0, %c0_i32 : i32, i32
  }
}

</mosaic_0001>

<bundles_post_ra>
// kernel: islr_forward.7
= control target key start
LH: loop header
LB: loop body
LE: loop exit
PB: predicated region body
PF: predicated region fallthrough
CT: control target
= control target key end

     0   :  { %vm25_vm0 = vcmask 261120   ;;  %v158_v5 = vmov 32.0   ;;  %s218_s0 = inlined_call_operand.vmem [shape: bf16[16,32], index: 0, kind: input, shape index: {}]   ;;  %s219_s1 = inlined_call_operand.vmem [shape: f32[1,32], index: 1, kind: input, shape index: {}]   ;;  %s220_s2 = inlined_call_operand.vmem [shape: f32[1,32], index: 2, kind: input, shape index: {}]   ;;  %s221_s4 = inlined_call_operand.vmem [shape: f32[1,128], index: 4, kind: input, shape index: {}]   ;;  %s222_s3 = inlined_call_operand.vmem [shape: bf16[32,128], index: 3, kind: input, shape index: {}]   ;;  %s223_s5 = inlined_call_operand.vmem [shape: f32[16,128], index: 5, kind: output, shape index: {}]  }
   0x1   :  { %v145_v0 = vld [vmem:[%s218_s0] sm:$0xff]   ;;  %152 = vrcp.f32 %v158_v5  ;;  %v143_v22 = vld [vmem:[%s222_s3 + $0x8] sm:$0xff] }
   0x2   :  { %v146_v1 = vunpack.c.l.bf16 %v145_v0  ;;  %v147_v3 = vunpack.c.h.bf16 %v145_v0  ;;  %119 = vmatpush.bf16.msra.mxu0 %v143_v22  ;;  %v142_v24 = vld [vmem:[%s222_s3] sm:$0xff] }
   0x3   :  { %v149_v43 = vld [vmem:[%s219_s1] ss:$0 sm:$0xff] }
   0x4   :  { %v26_v2 = vsel %vm25_vm0, %v146_v1, 0.0  ;;  %v29_v4 = vsel %vm25_vm0, %v147_v3, 0.0  ;;  %v150_v48 = vld [vmem:[%s220_s2] ss:$0 sm:$0xff] }
   0x5   :  { %27 = vadd.xlane.f32.xlu0 %v26_v2  ;;  %v151_v53 = vld [vmem:[%s221_s4] ss:$0 sm:$0xff] }
   0x6   :  { %120 = vmatpush.bf16.msra.mxu0 %v142_v24 }
   0x7   :  { %v153_v6 = vpop.eup %152 }
   0x8   :  { %v33_v7 = vmul.f32 32.0, %v153_v6  ;;  %vm37_vm1 = vweird.f32 %v153_v6 }
   0xa   :  { %v34_v8 = vsub.f32 1.0, %v33_v7 }
   0xc   :  { %v35_v9 = vmul.f32 %v153_v6, %v34_v8 }
   0xd   :  { %30 = vadd.xlane.f32.xlu0 %v29_v4 }
   0xe   :  { %v36_v10 = vadd.f32 %v153_v6, %v35_v9 }
  0x10   :  { %v38_v11 = vsel %vm37_vm1, %v153_v6, %v36_v10 }
  0x78   :  { %v28_v12 = vpop.xlane.xlu0 %27 }
  0x79   :  { %v39_v13 = vmul.f32 %v38_v11, %v28_v12 }
  0x7b   :  { %v41_v14 = vsub.f32 %v146_v1, %v39_v13 }
  0x7d   :  { %v43_v15 = vmul.f32 %v41_v14, %v41_v14 }
  0x7f   :  { %v45_v16 = vsel %vm25_vm0, %v43_v15, 0.0 }
  0x80   :  { %46 = vadd.xlane.f32.xlu1 %v45_v16  ;;  %v31_v17 = vpop.xlane.xlu0 %30 }
  0x81   :  { %v40_v18 = vmul.f32 %v38_v11, %v31_v17 }
  0x83   :  { %v42_v19 = vsub.f32 %v147_v3, %v40_v18 }
  0x85   :  { %v44_v20 = vmul.f32 %v42_v19, %v42_v19 }
  0x87   :  { %v48_v21 = vsel %vm25_vm0, %v44_v20, 0.0 }
  0x88   :  { %49 = vadd.xlane.f32.xlu1 %v48_v21 }
  0xf3   :  { %v47_v23 = vpop.xlane.xlu1 %46 }
  0xf4   :  { %v51_v25 = vmul.f32 %v47_v23, %v38_v11 }
  0xf6   :  { %v53_v26 = vadd.f32 1e-05, %v51_v25 }
  0xf8   :  { %154 = vrsqrt.f32 %v53_v26  ;;  %vm61_vm3 = vweird.f32 %v53_v26 }
  0xfb   :  { %v50_v27 = vpop.xlane.xlu1 %49 }
  0xfc   :  { %v52_v28 = vmul.f32 %v50_v27, %v38_v11 }
  0xfe   :  { %v155_v29 = vpop.eup %154  ;;  %v54_v30 = vadd.f32 1e-05, %v52_v28 }
  0xff   :  { %v56_v31 = vmul.f32 %v155_v29, %v53_v26  ;;  %vm62_vm2 = vweird.f32 %v155_v29 }
 0x100   :  { %156 = vrsqrt.f32 %v54_v30  ;;  %vm63_vm4 = vmor %vm61_vm3, %vm62_vm2  ;;  %vm71_vm6 = vweird.f32 %v54_v30 }
 0x101   :  { %v57_v32 = vmul.f32 %v155_v29, %v56_v31 }
 0x103   :  { %v58_v33 = vmul.f32 0.5, %v57_v32 }
 0x105   :  { %v59_v34 = vsub.f32 1.5, %v58_v33 }
 0x106   :  { %v157_v35 = vpop.eup %156 }
 0x107   :  { %v60_v36 = vmul.f32 %v155_v29, %v59_v34  ;;  %v66_v37 = vmul.f32 %v157_v35, %v54_v30  ;;  %vm72_vm5 = vweird.f32 %v157_v35 }
 0x108   :  { %vm73_vm7 = vmor %vm71_vm6, %vm72_vm5 }
 0x109   :  { %v67_v38 = vmul.f32 %v157_v35, %v66_v37  ;;  %v64_v39 = vsel %vm63_vm4, %v155_v29, %v60_v36 }
 0x10a   :  { %v75_v42 = vmul.f32 %v64_v39, %v41_v14 }
 0x10b   :  { %v68_v40 = vmul.f32 0.5, %v67_v38 }
 0x10c   :  { %v81_v47 = vmul.f32 %v149_v43, %v75_v42 }
 0x10d   :  { %v69_v41 = vsub.f32 1.5, %v68_v40 }
 0x10e   :  { %v87_v50 = vadd.f32 %v150_v48, %v81_v47 }
 0x10f   :  { %v70_v44 = vmul.f32 %v157_v35, %v69_v41 }
 0x111   :  { %v74_v45 = vsel %vm73_vm7, %v157_v35, %v70_v44 }
 0x112   :  { %v76_v46 = vmul.f32 %v74_v45, %v42_v19 }
 0x114   :  { %v82_v49 = vmul.f32 %v149_v43, %v76_v46 }
 0x116   :  { %v88_v51 = vadd.f32 %v150_v48, %v82_v49 }
 0x118   :  { %v89_v52 = vpack.c.bf16 %v88_v51, %v87_v50 }
 0x11a   :  { %141 = vmatmul.msk.bf16.vlgmr.msra.gmra.mxu0 %vm25_vm0, %v89_v52 }
 0x197   :  { %v122_v54 = vpop.f32.mrf.mxu0 }
 0x198   :  { %v123_v55 = vadd.f32 %v151_v53, %v122_v54 }
 0x19a   :  { %127 = vst [vmem:[%s223_s5] sm:$0xff] %v123_v55 }
 0x19f   :  { %v124_v56 = vpop.f32.mrf.mxu0 }
 0x1a0   :  { %v125_v57 = vadd.f32 %v151_v53, %v124_v56 }
 0x1a2   :  { %128 = vst [vmem:[%s223_s5 + $0x8] sm:$0xff] %v125_v57 }

// kernel: islr_forward.5
= control target key start
LH: loop header
LB: loop body
LE: loop exit
PB: predicated region body
PF: predicated region fallthrough
CT: control target
= control target key end

     0   :  { %s1611_s21 = smov 0   ;;  %s1613_s22 = smov 0   ;;  %s1822_s0 = inlined_call_operand.vmem [shape: bf16[2,8,32], index: 0, kind: input, shape index: {}]   ;;  %s1823_s1 = inlined_call_operand.vmem [shape: f32[2,1,32], index: 1, kind: input, shape index: {}]   ;;  %s1824_s2 = inlined_call_operand.vmem [shape: f32[2,1,32], index: 2, kind: input, shape index: {}]   ;;  %s1825_s3 = inlined_call_operand.vmem [shape: bf16[2,32,96], index: 3, kind: input, shape index: {}]   ;;  %s1826_s4 = inlined_call_operand.vmem [shape: bf16[2,32,32], index: 4, kind: input, shape index: {}]   ;;  %s1827_s5 = inlined_call_operand.vmem [shape: f32[2,1,32], index: 5, kind: input, shape index: {}]   ;;  %s1828_s6 = inlined_call_operand.vmem [shape: f32[2,1,32], index: 6, kind: input, shape index: {}]   ;;  %s1829_s7 = inlined_call_operand.vmem [shape: f32[2,1,32], index: 7, kind: input, shape index: {}]   ;;  %s1830_s8 = inlined_call_operand.vmem [shape: bf16[2,32,64], index: 8, kind: input, shape index: {}]   ;;  %s1831_s9 = inlined_call_operand.vmem [shape: f32[2,1,64], index: 9, kind: input, shape index: {}]   ;;  %s1832_s10 = inlined_call_operand.vmem [shape: bf16[2,64,32], index: 10, kind: input, shape index: {}]   ;;  %s1833_s11 = inlined_call_operand.vmem [shape: f32[2,1,32], index: 11, kind: input, shape index: {}]   ;;  %s1834_s12 = inlined_call_operand.vmem [shape: bf16[2,8,32], index: 12, kind: output, shape index: {}]  }
   0x1   :  { %1840 = sst [smem:[#allocation10_spill]] %s1822_s0  ;;  %s1615_s23 = smov 0  }
   0x2   :  { %1841 = sst [smem:[#allocation11_spill]] %s1825_s3  ;;  %s1617_s24 = smov 0  }
   0x3   :  { %1842 = sst [smem:[#allocation12_spill]] %s1826_s4  ;;  %s1619_s25 = smov 0  }
   0x4 LB: > { %1843 = sst [smem:[#allocation3_spill]] %s1513_s21  ;;  %s31_s26 = sadd.s32 1, %s1521_s23  ;;  %s1529_s25 = sphi %s1619_s25, %s22_s25   ;;  %s1525_s24 = sphi %s1617_s24, %s1864_s24   ;;  %s1521_s23 = sphi %s1615_s23, %s1863_s23   ;;  %s1517_s22 = sphi %s1613_s22, %s1862_s22   ;;  %s1513_s21 = sphi %s1611_s21, %s1861_s21  }
   0x5   : > { %1844 = sst [smem:[#allocation4_spill]] %s1521_s23  ;;  %s34_s27 = sadd.s32 1, %s1525_s24 }
   0x6   : > { %1845 = sst [smem:[#allocation5_spill]] %s1525_s24  ;;  %p32_p0 = scmp.ge.s32.totalorder %s31_s26, 2 }
   0x7   : > { %1846 = sst [smem:[#allocation6_spill]] %s1529_s25  ;;  %p1320_p1 = scmp.ge.s32.totalorder %s1529_s25, 1 }
   0x8   : > { %p469_p2 = scmp.lt.s32.totalorder %s1529_s25, 5  ;;  %s1866_s26 = smov (%p32_p0, %s31_s26), 0 }
   0x9   : > { %1847 = sst [smem:[#allocation7_spill]] %s1866_s26  ;;  %s1868_s27 = smov (!%p32_p0, %s34_s27), %s1525_s24 }
   0xa   : > { %p470_p3 = pnand %p1320_p1, %p469_p2  ;;  %p36_p4 = scmp.ge.s32.totalorder %s1868_s27, 2 }
   0xc   : > { %s1870_s27 = smov (%p36_p4, %s1868_s27), 0  ;;  %473 = sbr.rel (%p470_p3) target bundleno = 2305 (0x901), region = 68 }
   0xd   : > { %1848 = sst [smem:[#allocation8_spill]] %s1870_s27 }
  0x11   : > { %p550_p5 = scmp.lt.s32.totalorder %s1517_s22, 1  ;;  %p554_p6 = scmp.lt.s32.totalorder %s1513_s21, 1 }
  0x12   : > { %s1849_s0 = sld [smem:[#allocation10_spill]] }
  0x13   : > { %s1872_s22 = smov (!%p550_p5, %s1517_s22), 1  ;;  %s1850_s3 = sld [smem:[#allocation11_spill]] }
  0x14   : > { %s1645_s28 = scalar_select %p554_p6, %s1513_s21, 1 }
  0x15   : > { %s1321_s29 = sshll.u32 %s1872_s22, 2  ;;  %s1851_s4 = sld [smem:[#allocation12_spill]] }
  0x16   : > { %s1391_s27 = sshll.u32 %s1645_s28, 4  ;;  %s575_s18 = scalar_lea.vmem %s1828_s6, %s1645_s28 }
  0x17   : > { %s594_s20 = scalar_lea.vmem %s1833_s11, %s1645_s28  ;;  %s1703_s24 = scalar_lea.vmem %s1834_s12, %s1321_s29 }
  0x18   : > { %s553_s14 = scalar_lea.vmem %s1849_s0, %s1321_s29 }
  0x19   : > { %s1662_s23 = scalar_lea.vmem %s1850_s3, %s1391_s27  ;;  %s1684_s3 = scalar_lea.vmem %s1830_s8, %s1391_s27 }
  0x1b   : > { %s1667_s21 = scalar_lea.vmem %s1851_s4, %s1391_s27  ;;  %s586_s4 = scalar_lea.vmem %s1831_s9, %s1645_s28 }
  0x1c   : > { %1852 = sst [smem:[#allocation9_spill]] %s1667_s21  ;;  %s1394_s21 = sshll.u32 %s1645_s28, 5 }
  0x1d   : > { %s1694_s15 = scalar_lea.vmem %s1832_s10, %s1394_s21  ;;  %s1853_s27 = sld [smem:[#allocation3_spill]] }
  0x23   : > { %p1331_p7 = scmp.ne.s32.totalorder %s1853_s27, 0 }
  0x25   : > { %603 = sbr.rel (%p1331_p7) target bundleno = 46 (0x2e), region = 72 }
  0x2a   : > { %v604_v0 = vld [vmem:[%s553_s14] sm:$0xf]  ;;  %vm606_vm0 = vcmask 261120  }
  0x2b   : > { %v605_v1 = vunpack.c.l.bf16 %v604_v0 }
  0x2d   : > { %607 = vst.msk [vmem:[#allocation2] sm:$0xff] %vm606_vm0, %v605_v1 }
  0x2e PF: > { %vm609_vm1 = vcmask 261120   ;;  %v1531_v4 = vmov 32.0   ;;  %v1396_v16 = vld [vmem:[%s1662_s23 + $0x8] sm:$0xff]  ;;  %v1395_v17 = vld [vmem:[%s1662_s23] sm:$0xff]  ;;  %s1854_s23 = scalar_lea.vmem %s1823_s1, %s1645_s28  ;;  %s1855_s26 = scalar_lea.vmem %s1824_s2, %s1645_s28  ;;  %vm685_vm6 = vcmask 64512   ;;  %vm955_vm7 = vcmask 130048  }
  0x2f   : > { %1467 = vrcp.f32 %v1531_v4  ;;  %675 = vmatpush.bf16.msra.mxu0 %v1396_v16  ;;  %v1460_v27 = vld [vmem:[%s1854_s23] ss:$0 sm:$0xff]  ;;  %s1532_s25 = smov 64   ;;  %s1533_s22 = smov 96   ;;  %vm957_vm8 = vcmask 195584   ;;  %vm1109_vm12 = vcmask 523264  }
  0x30   : > { %v1461_v30 = vld [vmem:[%s1855_s26] ss:$0 sm:$0xff]  ;;  %s1534_s30 = smov 88   ;;  %s1535_s13 = smov 80  }
  0x31   : > { %s1536_s17 = smov 120   ;;  %s1537_s16 = smov 56  }
  0x32   : > { %s1538_s19 = smov 112   ;;  %s1539_s27 = smov 72  }
  0x33   : > { %676 = vmatpush.bf16.msra.mxu0 %v1395_v17  ;;  %s1540_s0 = smov 104   ;;  %s1541_s21 = smov 48  }
  0x34   : > { %v1706_v2 = vld [vmem:[#allocation2] sm:$0xff]  ;;  %s1542_s23 = smov 8   ;;  %s1543_s29 = smov 40  }
  0x35   : > { %v610_v3 = vsel %vm609_vm1, %v1706_v2, 0.0  ;;  %v1468_v5 = vpop.eup %1467  ;;  %s1856_s14 = sld [smem:[#allocation9_spill]]  ;;  %s1544_s26 = smov 16  }
  0x36   : > { %611 = vadd.xlane.f32.xlu0 %v610_v3  ;;  %v614_v6 = vmul.f32 32.0, %v1468_v5  ;;  %vm618_vm2 = vweird.f32 %v1468_v5 }
  0x38   : > { %v615_v7 = vsub.f32 1.0, %v614_v6 }
  0x3a   : > { %v616_v8 = vmul.f32 %v1468_v5, %v615_v7 }
  0x3c   : > { %v617_v9 = vadd.f32 %v1468_v5, %v616_v8 }
  0x3e   : > { %v1710_v10 = vsel %vm618_vm2, %v1468_v5, %v617_v9 }
  0xa9   : > { %v612_v11 = vpop.xlane.xlu0 %611 }
  0xaa   : > { %v620_v12 = vmul.f32 %v1710_v10, %v612_v11 }
  0xac   : > { %v621_v13 = vsub.f32 %v1706_v2, %v620_v12 }
  0xae   : > { %v622_v14 = vmul.f32 %v621_v13, %v621_v13 }
  0xb0   : > { %v623_v15 = vsel %vm609_vm1, %v622_v14, 0.0 }
  0xb1   : > { %624 = vadd.xlane.f32.xlu0 %v623_v15 }
 0x124   : > { %v625_v18 = vpop.xlane.xlu0 %624 }
 0x125   : > { %v626_v19 = vmul.f32 %v625_v18, %v1710_v10 }
 0x127   : > { %v627_v20 = vadd.f32 1e-05, %v626_v19 }
 0x129   : > { %1469 = vrsqrt.f32 %v627_v20  ;;  %vm634_vm4 = vweird.f32 %v627_v20 }
 0x12f   : > { %v1470_v21 = vpop.eup %1469 }
 0x130   : > { %v629_v22 = vmul.f32 %v1470_v21, %v627_v20  ;;  %vm635_vm3 = vweird.f32 %v1470_v21 }
 0x131   : > { %vm636_vm5 = vmor %vm634_vm4, %vm635_vm3 }
 0x132   : > { %v630_v23 = vmul.f32 %v1470_v21, %v629_v22 }
 0x134   : > { %v631_v24 = vmul.f32 0.5, %v630_v23 }
 0x136   : > { %v632_v25 = vsub.f32 1.5, %v631_v24 }
 0x138   : > { %v633_v26 = vmul.f32 %v1470_v21, %v632_v25 }
 0x13a   : > { %v637_v28 = vsel %vm636_vm5, %v1470_v21, %v633_v26 }
 0x13b   : > { %v638_v29 = vmul.f32 %v637_v28, %v621_v13 }
 0x13d   : > { %v643_v31 = vmul.f32 %v1460_v27, %v638_v29  ;;  %v1398_v29 = vld [vmem:[%s1856_s14 + $0x8] sm:$0xff] }
 0x13f   : > { %v648_v32 = vadd.f32 %v1461_v30, %v643_v31  ;;  %v1397_v30 = vld [vmem:[%s1856_s14] sm:$0xff] }
 0x141   : > { %v649_v33 = vpack.c.bf16 %v648_v32, %v648_v32 }
 0x143   : > { %1340 = vmatmul.msk.bf16.vlgmr.msra.gmra.mxu0 %vm609_vm1, %v649_v33 }
 0x1c0   : > { %v1729_v34 = vpop.f32.mrf.mxu0 }
 0x1c1   : > { %721 = vrot.lane.b32.xlu0 %v1729_v34, %s1532_s25  ;;  %683 = vrot.lane.b32.xlu2 %v1729_v34, %s1533_s22  ;;  %s1545_s25 = smov 24  }
 0x1c2   : > { %749 = vrot.lane.b32.xlu1 %v1729_v34, %s1534_s30 }
 0x1c8   : > { %v680_v35 = vpop.f32.mrf.mxu0 }
 0x1c9   : > { %814 = vrot.lane.b32.xlu0 %v1729_v34, %s1535_s13  ;;  %s1857_s13 = scalar_lea.vmem %s1827_s5, %s1645_s28 }
 0x1ca   : > { %747 = vrot.lane.b32.xlu1 %v1729_v34, %s1536_s17 }
 0x21b   : > { %v684_v36 = vpop.permute.xlu2 %683 }
 0x21c   : > { %1341 = vmatpush.xpose.msk.msra.mxu1 %vm685_vm6, %v684_v36 }
 0x21f   : > { %1342 = vmatmul.msk.f32.vlgmr.msra.gmra.mxu1 %vm685_vm6, %v1729_v34 }
 0x233   : > { %v722_v37 = vpop.permute.xlu0 %721 }
 0x234   : > { %v750_v38 = vpop.permute.xlu1 %749  ;;  %742 = vmatpush.msrb.mxu1 %v722_v37 }
 0x235   : > { %1344 = vmatpush.xpose.msk.msra.mxu3 %vm685_vm6, %v750_v38  ;;  %v1462_v38 = vld [vmem:[%s1857_s13] ss:$0 sm:$0xff] }
 0x23b   : > { %v815_v39 = vpop.permute.xlu0 %814 }
 0x23c   : > { %v748_v40 = vpop.permute.xlu1 %747  ;;  %1347 = vmatpush.xpose.msk.msra.mxu1 %vm685_vm6, %v815_v39 }
 0x23d   : > { %1345 = vmatmul.msk.f32.vlgmr.msra.gmra.mxu3 %vm685_vm6, %v748_v40 }
 0x29c   : > { %v707_v41 = vpop.f32.mrf.mxu1 }
 0x29d   : > { %v710_v42 = vsel %vm685_vm6, %v707_v41, -inf }
 0x29e   : > { %711 = vmax.xlane.f32.xlu2 %v710_v42 }
 0x2b6   : > { %786 = vrot.lane.b32.xlu2 %v1729_v34, %s1537_s16 }
 0x2c0   : > { %v772_v43 = vpop.f32.mrf.mxu3 }
 0x2c1   : > { %v775_v44 = vsel %vm685_vm6, %v772_v43, -inf }
 0x2c2   : > { %776 = vmax.xlane.f32.xlu0 %v775_v44 }
 0x2d6   : > { %812 = vrot.lane.b32.xlu0 %v1729_v34, %s1538_s19 }
 0x311   : > { %v712_v45 = vpop.xlane.xlu2 %711 }
 0x312   : > { %v713_v46 = vsub.f32 %v707_v41, %v712_v45 }
 0x314   : > { %v714_v47 = vmul.f32 1.442695, %v713_v46 }
 0x316   : > { %1471 = vpow2.f32 %v714_v47 }
 0x319   : > { %v787_v48 = vpop.permute.xlu2 %786 }
 0x31a   : > { %807 = vmatpush.msra.mxu2 %v787_v48 }
 0x31c   : > { %v1472_v49 = vpop.eup %1471 }
 0x31d   : > { %v716_v50 = vsel %vm685_vm6, %v1472_v49, 0.0 }
 0x31e   : > { %717 = vadd.xlane.f32.xlu1 %v716_v50  ;;  %v1399_v50 = vld [vmem:[%s1684_s3] sm:$0xff] }
 0x335   : > { %v777_v51 = vpop.xlane.xlu0 %776 }
 0x336   : > { %v778_v52 = vsub.f32 %v772_v43, %v777_v51 }
 0x337   : > { %879 = vrot.lane.b32.xlu1 %v1729_v34, %s1539_s27  ;;  %s1858_s27 = scalar_lea.vmem %s1829_s7, %s1645_s28 }
 0x338   : > { %v779_v53 = vmul.f32 1.442695, %v778_v52 }
 0x33a   : > { %1473 = vpow2.f32 %v779_v53 }
 0x340   : > { %v1474_v54 = vpop.eup %1473 }
 0x341   : > { %v781_v55 = vsel %vm685_vm6, %v1474_v54, 0.0 }
 0x342   : > { %782 = vadd.xlane.f32.xlu0 %v781_v55 }
 0x348   : > { %v813_v59 = vpop.permute.xlu0 %812 }
 0x356   : > { %877 = vrot.lane.b32.xlu0 %v1729_v34, %s1540_s0 }
 0x391   : > { %v718_v56 = vpop.xlane.xlu1 %717 }
 0x392   : > { %1475 = vrcp.f32 %v718_v56 }
 0x398   : > { %v1476_v57 = vpop.eup %1475 }
 0x399   : > { %v720_v58 = vmul.f32 %v1476_v57, %v1472_v49  ;;  %v1400_v49 = vld [vmem:[%s1684_s3 + $0x8] sm:$0xff] }
 0x39a   : > { %1060 = vmatpush.bf16.msrb.mxu0 %v1400_v49 }
 0x39b   : > { %1343 = vmatmul.msk.f32.vlgmr.msrb.gmra.mxu1 %vm685_vm6, %v720_v58 }
 0x39e   : > { %1061 = vmatpush.bf16.msrb.mxu0 %v1399_v50 }
 0x3a3   : > { %1348 = vmatmul.msk.f32.vlgmr.msra.gmra.mxu1 %vm685_vm6, %v813_v59 }
 0x3a9   : > { %v880_v60 = vpop.permute.xlu1 %879 }
 0x3aa   : > { %1350 = vmatpush.xpose.msk.msrb.mxu2 %vm685_vm6, %v880_v60 }
 0x3b5   : > { %v783_v61 = vpop.xlane.xlu0 %782 }
 0x3b6   : > { %1477 = vrcp.f32 %v783_v61  ;;  %v1464_v61 = vld [vmem:[%s1858_s27] ss:$0 sm:$0xff] }
 0x3bc   : > { %v1478_v62 = vpop.eup %1477 }
 0x3bd   : > { %v785_v63 = vmul.f32 %v1478_v62, %v1474_v54 }
 0x3bf   : > { %1346 = vmatmul.msk.f32.vlgmr.msra.gmra.mxu2 %vm685_vm6, %v785_v63 }
 0x3c8   : > { %v878_v0 = vpop.permute.xlu0 %877 }
 0x3c9   : > { %1351 = vmatmul.msk.f32.vlgmr.msrb.gmra.mxu2 %vm685_vm6, %v878_v0 }
 0x418   : > { %v744_v1 = vpop.f32.mrf.mxu1 }
 0x420   : > { %v837_v3 = vpop.f32.mrf.mxu1 }
 0x421   : > { %v840_v4 = vsel %vm685_vm6, %v837_v3, -inf }
 0x422   : > { %841 = vmax.xlane.f32.xlu2 %v840_v4  ;;  %v1402_v4 = vld [vmem:[%s1694_s15 + $0x8] sm:$0xff] }
 0x442   : > { %v809_v5 = vpop.f32.mrf.mxu2 }
 0x44c   : > { %v902_v6 = vpop.f32.mrf.mxu2 }
 0x44d   : > { %v905_v7 = vsel %vm685_vm6, %v902_v6, -inf }
 0x44e   : > { %906 = vmax.xlane.f32.xlu0 %v905_v7 }
 0x462   : > { %851 = vrot.lane.b32.xlu0 %v1729_v34, %s1541_s21 }
 0x495   : > { %v842_v8 = vpop.xlane.xlu2 %841 }
 0x496   : > { %v843_v9 = vsub.f32 %v837_v3, %v842_v8  ;;  %v1403_v3 = vld [vmem:[%s1694_s15 + $0x10] sm:$0xff] }
 0x498   : > { %v844_v11 = vmul.f32 1.442695, %v843_v9 }
 0x49a   : > { %1479 = vpow2.f32 %v844_v11 }
 0x4a0   : > { %v1480_v12 = vpop.eup %1479 }
 0x4a1   : > { %v846_v13 = vsel %vm685_vm6, %v1480_v12, 0.0 }
 0x4a2   : > { %847 = vadd.xlane.f32.xlu1 %v846_v13 }
 0x4bb   : > { %943 = vrot.lane.b32.xlu1 %v809_v5, %s1542_s23  ;;  %v1401_v5 = vld [vmem:[%s1694_s15] sm:$0xff] }
 0x4c1   : > { %v907_v14 = vpop.xlane.xlu0 %906 }
 0x4c2   : > { %v908_v15 = vsub.f32 %v902_v6, %v907_v14  ;;  %v1465_v6 = vld [vmem:[%s586_s4] ss:$0 sm:$0xff]  ;;  %s1859_s4 = sld [smem:[#allocation3_spill]] }
 0x4c4   : > { %v909_v16 = vmul.f32 1.442695, %v908_v15 }
 0x4c6   : > { %1481 = vpow2.f32 %v909_v16 }
 0x4c8   : > { %p1388_p8 = scmp.ne.s32.totalorder %s1859_s4, 1 }
 0x4cc   : > { %v1482_v17 = vpop.eup %1481 }
 0x4cd   : > { %v911_v18 = vsel %vm685_vm6, %v1482_v17, 0.0 }
 0x4ce   : > { %912 = vadd.xlane.f32.xlu2 %v911_v18 }
 0x4d4   : > { %v852_v19 = vpop.permute.xlu0 %851 }
 0x4d5   : > { %872 = vmatpush.msrb.mxu3 %v852_v19 }
 0x4d7   : > { %985 = vmatpush.bf16.msra.mxu3 %v1398_v29 }
 0x4db   : > { %986 = vmatpush.bf16.msra.mxu3 %v1397_v30 }
 0x4e6   : > { %916 = vrot.lane.b32.xlu2 %v1729_v34, %s1543_s29 }
 0x515   : > { %v848_v20 = vpop.xlane.xlu1 %847 }
 0x516   : > { %1483 = vrcp.f32 %v848_v20 }
 0x51c   : > { %v1484_v21 = vpop.eup %1483 }
 0x51d   : > { %v850_v22 = vmul.f32 %v1484_v21, %v1480_v12  ;;  %v1466_v21 = vld [vmem:[%s594_s20] ss:$0 sm:$0xff] }
 0x51f   : > { %1349 = vmatmul.msk.f32.vlgmr.msrb.gmra.mxu3 %vm685_vm6, %v850_v22 }
 0x52d   : > { %v944_v32 = vpop.permute.xlu1 %943 }
 0x52e   : > { %v954_v33 = vsel %vm685_vm6, %v744_v1, %v944_v32  ;;  %v1404_v1 = vld [vmem:[%s1694_s15 + $0x18] sm:$0xff] }
 0x52f   : > { %1117 = vmatpush.bf16.msra.mxu2 %v1404_v1 }
 0x533   : > { %1118 = vmatpush.bf16.msra.mxu2 %v1403_v3 }
 0x537   : > { %1119 = vmatpush.bf16.msra.mxu2 %v1402_v4 }
 0x53b   : > { %1120 = vmatpush.bf16.msra.mxu2 %v1401_v5 }
 0x541   : > { %v913_v23 = vpop.xlane.xlu2 %912 }
 0x542   : > { %1485 = vrcp.f32 %v913_v23 }
 0x548   : > { %v1486_v24 = vpop.eup %1485 }
 0x549   : > { %v915_v25 = vmul.f32 %v1486_v24, %v1482_v17  ;;  %v917_v26 = vpop.permute.xlu2 %916 }
 0x54a   : > { %937 = vmatpush.msrb.mxu1 %v917_v26 }
 0x54b   : > { %1352 = vmatmul.msk.f32.vlgmr.msrb.gmra.mxu1 %vm685_vm6, %v915_v25 }
 0x5a2   : > { %v874_v27 = vpop.f32.mrf.mxu3 }
 0x5a3   : > { %947 = vrot.lane.b32.xlu0 %v874_v27, %s1544_s26 }
 0x5c8   : > { %v939_v28 = vpop.f32.mrf.mxu1 }
 0x5c9   : > { %951 = vrot.lane.b32.xlu0 %v939_v28, %s1545_s25 }
 0x615   : > { %v948_v31 = vpop.permute.xlu0 %947 }
 0x616   : > { %v956_v34 = vsel %vm955_vm7, %v954_v33, %v948_v31 }
 0x63b   : > { %v952_v35 = vpop.permute.xlu0 %951 }
 0x63c   : > { %v958_v36 = vsel %vm957_vm8, %v956_v34, %v952_v35 }
 0x63d   : > { %v959_v37 = vpack.c.bf16 %v958_v36, %v958_v36 }
 0x63f   : > { %1361 = vmatmul.msk.bf16.vlgmr.msra.gmra.mxu3 %vm609_vm1, %v959_v37 }
 0x6c2   : > { %v988_v39 = vpop.f32.mrf.mxu3 }
 0x6c3   : > { %v992_v40 = vadd.f32 %v988_v39, %v1706_v2 }
 0x6c5   : > { %v997_v41 = vadd.f32 %v1462_v38, %v992_v40 }
 0x6c7   : > { %v998_v42 = vsel %vm609_vm1, %v997_v41, 0.0 }
 0x6c8   : > { %999 = vadd.xlane.f32.xlu2 %v998_v42 }
 0x6ca   : > { %v990_v43 = vpop.f32.mrf.mxu3 }
 0x73b   : > { %v1000_v44 = vpop.xlane.xlu2 %999 }
 0x73c   : > { %v1001_v45 = vmul.f32 %v1000_v44, %v1710_v10 }
 0x73e   : > { %v1002_v46 = vsub.f32 %v997_v41, %v1001_v45 }
 0x740   : > { %v1003_v47 = vmul.f32 %v1002_v46, %v1002_v46 }
 0x742   : > { %v1004_v48 = vsel %vm609_vm1, %v1003_v47, 0.0 }
 0x743   : > { %1005 = vadd.xlane.f32.xlu1 %v1004_v48 }
 0x7b6   : > { %v1006_v51 = vpop.xlane.xlu1 %1005 }
 0x7b7   : > { %v1007_v2 = vmul.f32 %v1006_v51, %v1710_v10  ;;  %v1463_v10 = vld [vmem:[%s575_s18] ss:$0 sm:$0xff] }
 0x7b9   : > { %v1008_v52 = vadd.f32 1e-05, %v1007_v2 }
 0x7bb   : > { %1487 = vrsqrt.f32 %v1008_v52  ;;  %vm1015_vm10 = vweird.f32 %v1008_v52 }
 0x7c1   : > { %v1488_v53 = vpop.eup %1487 }
 0x7c2   : > { %v1010_v54 = vmul.f32 %v1488_v53, %v1008_v52  ;;  %vm1016_vm9 = vweird.f32 %v1488_v53 }
 0x7c3   : > { %vm1017_vm11 = vmor %vm1015_vm10, %vm1016_vm9 }
 0x7c4   : > { %v1011_v55 = vmul.f32 %v1488_v53, %v1010_v54 }
 0x7c6   : > { %v1012_v56 = vmul.f32 0.5, %v1011_v55 }
 0x7c8   : > { %v1013_v57 = vsub.f32 1.5, %v1012_v56 }
 0x7ca   : > { %v1014_v58 = vmul.f32 %v1488_v53, %v1013_v57 }
 0x7cc   : > { %v1018_v59 = vsel %vm1017_vm11, %v1488_v53, %v1014_v58 }
 0x7cd   : > { %v1019_v60 = vmul.f32 %v1018_v59, %v1002_v46 }
 0x7cf   : > { %v1024_v62 = vmul.f32 %v1463_v10, %v1019_v60 }
 0x7d1   : > { %v1029_v63 = vadd.f32 %v1464_v61, %v1024_v62 }
 0x7d3   : > { %v1030_v0 = vpack.c.bf16 %v1029_v63, %v1029_v63 }
 0x7d5   : > { %1370 = vmatmul.msk.bf16.vlgmr.msrb.gmra.mxu0 %vm609_vm1, %v1030_v0 }
 0x852   : > { %v1063_v7 = vpop.f32.mrf.mxu0 }
 0x853   : > { %v1064_v8 = vadd.f32 %v1465_v6, %v1063_v7 }
 0x855   : > { %v1067_v9 = vmul.f32 %v1064_v8, %v1064_v8 }
 0x857   : > { %v1068_v11 = vmul.f32 %v1067_v9, %v1064_v8 }
 0x859   : > { %v1069_v12 = vmul.f32 0.044715, %v1068_v11 }
 0x85a   : > { %v1065_v13 = vpop.f32.mrf.mxu0 }
 0x85b   : > { %v1070_v14 = vadd.f32 %v1069_v12, %v1064_v8 }
 0x85d   : > { %v1071_v15 = vmul.f32 0.7978846, %v1070_v14 }
 0x85f   : > { %1489 = vtanh.f32 %v1071_v15 }
 0x865   : > { %v1490_v16 = vpop.eup %1489 }
 0x866   : > { %v1073_v17 = vadd.f32 1.0, %v1490_v16 }
 0x868   : > { %v1074_v18 = vmul.f32 0.5, %v1073_v17 }
 0x86a   : > { %v1075_v19 = vmul.f32 %v1074_v18, %v1064_v8 }
 0x86c   : > { %v1076_v20 = vpack.c.bf16 %v1075_v19, %v1075_v19 }
 0x86e   : > { %1387 = vmatmul.msk.bf16.vlgmr.msra.gmra.mxu2 %vm1109_vm12, %v1076_v20 }
 0x8f1   : > { %v1122_v22 = vpop.f32.mrf.mxu2 }
 0x8f2   : > { %v1126_v23 = vadd.f32 %v1122_v22, %v997_v41 }
 0x8f4   : > { %v1131_v24 = vadd.f32 %v1466_v21, %v1126_v23 }
 0x8f5   : > { %1136 = sbr.rel (%p1388_p8) target bundleno = 2305 (0x901), region = 76 }
 0x8f6   : > { %1132 = vst.msk [vmem:[#allocation2] sm:$0xff] %vm609_vm1, %v1131_v24 }
 0x8f9   : > { %v1124_v25 = vpop.f32.mrf.mxu2 }
 0x8fa   : > { %vm1139_vm13 = vcmask 257024  }
 0x8fd   : > { %v1137_v26 = vld [vmem:[#allocation2] sm:$0xff] }
 0x8fe   : > { %v1138_v27 = vpack.c.bf16 %v1137_v26, %v1137_v26 }
 0x900   : > { %1140 = vst.msk [vmem:[%s1703_s24] sm:$0xf] %vm1139_vm13, %v1138_v27 }
 0x901 PF: > { %s1860_s23 = sld [smem:[#allocation6_spill]] }
 0x902   : > { %s1861_s21 = sld [smem:[#allocation4_spill]] }
 0x903   : > { %s1862_s22 = sld [smem:[#allocation5_spill]] }
 0x904   : > { %s1864_s24 = sld [smem:[#allocation8_spill]] }
 0x907   : > { %s22_s25 = sadd.s32 1, %s1860_s23   ;;  %s1863_s23 = sld [smem:[#allocation7_spill]] }
 0x908   : > { %p19_p9 = scmp.ge.s32.totalorder %s22_s25, 6  }
 0x90a   :  { %21 = sbr.rel (!%p19_p9) target bundleno = 4 (0x4), region = 139 }

// kernel: islr_forward.6
= control target key start
LH: loop header
LB: loop body
LE: loop exit
PB: predicated region body
PF: predicated region fallthrough
CT: control target
= control target key end

     0   :  { %vm24_vm0 = vcmask 254976   ;;  %s220_s0 = inlined_call_operand.vmem [shape: bf16[2,32], index: 0, kind: input, shape index: {}]   ;;  %s221_s1 = inlined_call_operand.vmem [shape: f32[1,32], index: 1, kind: input, shape index: {}]   ;;  %s222_s2 = inlined_call_operand.vmem [shape: f32[1,32], index: 2, kind: input, shape index: {}]   ;;  %s223_s3 = inlined_call_operand.vmem [shape: bf16[32,128], index: 3, kind: input, shape index: {}]   ;;  %s224_s4 = inlined_call_operand.vmem [shape: f32[1,128], index: 4, kind: input, shape index: {}]   ;;  %s225_s5 = inlined_call_operand.hbm [shape: f32[2,128], index: 5, kind: output, shape index: {}]  }
   0x1   :  { %v22_v0 = vld [vmem:[%s220_s0] sm:$0x1] }
   0x2   :  { %v23_v1 = vunpack.c.l.bf16 %v22_v0 }
   0x3   :  { %10 = vsyncpa [#allocation3], 0  ;;  %v165_v3 = vmov 32.0   ;;  %v129_v15 = vld [vmem:[%s223_s3 + $0x8] sm:$0xff]  ;;  %v128_v16 = vld [vmem:[%s223_s3] sm:$0xff]  ;;  %vm85_vm5 = vcmask 261120  }
   0x4   :  { %v25_v2 = vsel %vm24_vm0, %v23_v1, 0.0  ;;  %135 = vrcp.f32 %v165_v3  ;;  %95 = vmatpush.bf16.msra.mxu0 %v129_v15  ;;  %v132_v26 = vld [vmem:[%s221_s1] ss:$0 sm:$0xff]  ;;  %s166_s28 = smov [#allocation2]   ;;  %s110_s1 = sshll.u32 %s225_s5, 4  ;;  %s111_s1 = int_to_ptr.hbm [resolvable:$true] %s110_s1 }
   0x5   :  { %26 = vadd.xlane.f32.xlu0 %v25_v2  ;;  %v133_v29 = vld [vmem:[%s222_s2] ss:$0 sm:$0xff]  ;;  %s108_s29 = sshll.u32 %s166_s28, 4  ;;  %s109_s29 = int_to_ptr.vmem [resolvable:$true] %s108_s29 }
   0x6   :  { %v134_v33 = vld [vmem:[%s224_s4] ss:$0 sm:$0xff] }
   0x8   :  { %96 = vmatpush.bf16.msra.mxu0 %v128_v16 }
   0xa   :  { %v136_v4 = vpop.eup %135 }
   0xb   :  { %v29_v5 = vmul.f32 32.0, %v136_v4  ;;  %vm33_vm1 = vweird.f32 %v136_v4 }
   0xd   :  { %v30_v6 = vsub.f32 1.0, %v29_v5 }
   0xf   :  { %v31_v7 = vmul.f32 %v136_v4, %v30_v6 }
  0x11   :  { %v32_v8 = vadd.f32 %v136_v4, %v31_v7 }
  0x13   :  { %v34_v9 = vsel %vm33_vm1, %v136_v4, %v32_v8 }
  0x78   :  { %v27_v10 = vpop.xlane.xlu0 %26 }
  0x79   :  { %v35_v11 = vmul.f32 %v34_v9, %v27_v10 }
  0x7b   :  { %v36_v12 = vsub.f32 %v23_v1, %v35_v11 }
  0x7d   :  { %v37_v13 = vmul.f32 %v36_v12, %v36_v12 }
  0x7f   :  { %v38_v14 = vsel %vm24_vm0, %v37_v13, 0.0 }
  0x80   :  { %39 = vadd.xlane.f32.xlu0 %v38_v14 }
  0xf3   :  { %v40_v17 = vpop.xlane.xlu0 %39 }
  0xf4   :  { %v41_v18 = vmul.f32 %v40_v17, %v34_v9 }
  0xf6   :  { %v42_v19 = vadd.f32 1e-05, %v41_v18 }
  0xf8   :  { %137 = vrsqrt.f32 %v42_v19  ;;  %vm49_vm3 = vweird.f32 %v42_v19 }
  0xfe   :  { %v138_v20 = vpop.eup %137 }
  0xff   :  { %v44_v21 = vmul.f32 %v138_v20, %v42_v19  ;;  %vm50_vm2 = vweird.f32 %v138_v20 }
 0x100   :  { %vm51_vm4 = vmor %vm49_vm3, %vm50_vm2 }
 0x101   :  { %v45_v22 = vmul.f32 %v138_v20, %v44_v21 }
 0x103   :  { %v46_v23 = vmul.f32 0.5, %v45_v22 }
 0x105   :  { %v47_v24 = vsub.f32 1.5, %v46_v23 }
 0x107   :  { %v48_v25 = vmul.f32 %v138_v20, %v47_v24 }
 0x109   :  { %v52_v27 = vsel %vm51_vm4, %v138_v20, %v48_v25 }
 0x10a   :  { %v53_v28 = vmul.f32 %v52_v27, %v36_v12 }
 0x10c   :  { %v58_v30 = vmul.f32 %v132_v26, %v53_v28 }
 0x10e   :  { %v63_v31 = vadd.f32 %v133_v29, %v58_v30 }
 0x110   :  { %v64_v32 = vpack.c.bf16 %v63_v31, %v63_v31 }
 0x112   :  { %127 = vmatmul.msk.bf16.vlgmr.msra.gmra.mxu0 %vm85_vm5, %v64_v32 }
 0x18f   :  { %v98_v34 = vpop.f32.mrf.mxu0 }
 0x190   :  { %v99_v35 = vadd.f32 %v134_v33, %v98_v34 }
 0x192   :  { %102 = vst [vmem:[#allocation2] sm:$0x3] %v99_v35 }
 0x193   :  { %113 = dma.vmem_to_hbm [thread:$0]  %s109_s29, 32, %s111_s1, [#allocation3]  }
 0x197   :  { %v100_v36 = vpop.f32.mrf.mxu0 }
 0x198   :  { %163 = dma.done.wait [#allocation3], 32  }
 0x199   :  { %164 = vsyncadd [#allocation3], 4294967264 }
 0x19a   :  { %118 = vsyncpa [#allocation3], 1 }

// kernel: islr_forward.4
= control target key start
LH: loop header
LB: loop body
LE: loop exit
PB: predicated region body
PF: predicated region fallthrough
CT: control target
= control target key end

     0   :  { %vm99_vm0 = vcmask 1040384   ;;  %vm100_vm1 = vcmask 1041408   ;;  %v2393_v2 = vmov 65535   ;;  %vm95_vm2 = vcmask 23552   ;;  %s2938_s1 = inlined_call_operand.vmem [shape: bf16[3,2048], index: 1, kind: input, shape index: {}]   ;;  %s2939_s0 = inlined_call_operand.vmem [shape: f32[16,3], index: 0, kind: input, shape index: {}]   ;;  %s2940_s3 = inlined_call_operand.vmem [shape: bf16[2048,64], index: 3, kind: input, shape index: {}]   ;;  %s2941_s4 = inlined_call_operand.vmem [shape: f32[1,64], index: 4, kind: input, shape index: {}]   ;;  %s2942_s2 = inlined_call_operand.vmem [shape: f32[1,2048], index: 2, kind: input, shape index: {}]   ;;  %s2943_s6 = inlined_call_operand.vmem [shape: f32[1,32], index: 6, kind: input, shape index: {}]   ;;  %s2944_s5 = inlined_call_operand.vmem [shape: bf16[64,32], index: 5, kind: input, shape index: {}]   ;;  %s2945_s7 = inlined_call_operand.vmem [shape: bf16[16,32], index: 7, kind: output, shape index: {}]  }
   0x1   :  { %v30_v0 = vld [vmem:[%s2938_s1] sm:$0xff]  ;;  %v31_v1 = vld [vmem:[%s2938_s1 + $0x8] sm:$0xff]  ;;  %v101_v3 = vsel %vm99_vm0, 4294967295, %v2393_v2  ;;  %v32_v5 = vld [vmem:[%s2938_s1 + $0x10] sm:$0xff]  ;;  %vm1682_vm3 = vcmask 523264   ;;  %vm1702_vm4 = vcmask 257024  }
   0x2   :  { %71 = vst [vmem:[#allocation1] ss:$4 sm:$0xff] %v30_v0  ;;  %v2440_v4 = vsel %vm100_vm1, %v101_v3, 0  ;;  %v27_v6 = vld [vmem:[%s2939_s0] sm:$0xff]  ;;  %v28_v7 = vld [vmem:[%s2939_s0 + $0x8] sm:$0xff]  ;;  %v33_v18 = vld [vmem:[%s2938_s1 + $0x18] sm:$0xff] }
   0x3   :  { %74 = vst [vmem:[#allocation1 + $0x20] ss:$4 sm:$0xff] %v31_v1  ;;  %v2455_v16 = vpack.c.bf16 %v28_v7, %v27_v6  ;;  %v2261_v42 = vld [vmem:[%s2940_s3 + $0x38] sm:$0xff]  ;;  %v2260_v46 = vld [vmem:[%s2940_s3 + $0x30] sm:$0xff]  ;;  %v2259_v50 = vld [vmem:[%s2940_s3 + $0x28] sm:$0xff] }
   0x4   :  { %v2269_v43 = vld [vmem:[%s2940_s3 + $0x78] sm:$0xff]  ;;  %v2268_v47 = vld [vmem:[%s2940_s3 + $0x70] sm:$0xff]  ;;  %v2267_v51 = vld [vmem:[%s2940_s3 + $0x68] sm:$0xff] }
   0x5   :  { %v2277_v44 = vld [vmem:[%s2940_s3 + $0xb8] sm:$0xff]  ;;  %v2276_v48 = vld [vmem:[%s2940_s3 + $0xb0] sm:$0xff]  ;;  %v2275_v52 = vld [vmem:[%s2940_s3 + $0xa8] sm:$0xff] }
   0x6   :  { %v2285_v45 = vld [vmem:[%s2940_s3 + $0xf8] sm:$0xff]  ;;  %v2284_v49 = vld [vmem:[%s2940_s3 + $0xf0] sm:$0xff]  ;;  %v2283_v53 = vld [vmem:[%s2940_s3 + $0xe8] sm:$0xff] }
   0x7   :  { %v2258_v54 = vld [vmem:[%s2940_s3 + $0x20] sm:$0xff]  ;;  %v2257_v58 = vld [vmem:[%s2940_s3 + $0x18] sm:$0xff]  ;;  %v2256_v62 = vld [vmem:[%s2940_s3 + $0x10] sm:$0xff] }
   0x8   :  { %v2266_v55 = vld [vmem:[%s2940_s3 + $0x60] sm:$0xff]  ;;  %v2265_v59 = vld [vmem:[%s2940_s3 + $0x58] sm:$0xff]  ;;  %v2264_v63 = vld [vmem:[%s2940_s3 + $0x50] sm:$0xff] }
   0x9   :  { %v75_v8 = vld.sshfl [vmem:[#allocation1] sm:$0xff pattern:$0x73625140]  ;;  %v76_v9 = vld.sshfl [vmem:[#allocation1 + $0x8] sm:$0xff pattern:$0x73625140] }
   0xa   :  { %v103_v10 = vand.u32 %v2440_v4, %v75_v8  ;;  %v105_v11 = vand.u32 %v2440_v4, %v76_v9  ;;  %v77_v12 = vld.sshfl [vmem:[#allocation1 + $0x10] sm:$0xff pattern:$0x73625140]  ;;  %v78_v13 = vld.sshfl [vmem:[#allocation1 + $0x18] sm:$0xff pattern:$0x73625140] }
   0xb   :  { %v107_v14 = vand.u32 %v2440_v4, %v77_v12  ;;  %84 = vst [vmem:[#allocation1] ss:$4 sm:$0xff] %v32_v5  ;;  %v109_v15 = vand.u32 %v2440_v4, %v78_v13  ;;  %v81_v17 = vld.sshfl [vmem:[#allocation1 + $0x30] sm:$0xff pattern:$0x73625140]  ;;  %v2274_v56 = vld [vmem:[%s2940_s3 + $0xa0] sm:$0xff] }
   0xc   :  { %142 = vmatpush.bf16.msra.mxu0 %v103_v10  ;;  %156 = vmatpush.bf16.msra.mxu1 %v105_v11  ;;  %v115_v19 = vand.u32 %v2440_v4, %v81_v17  ;;  %v79_v20 = vld.sshfl [vmem:[#allocation1 + $0x20] sm:$0xff pattern:$0x73625140]  ;;  %v82_v21 = vld.sshfl [vmem:[#allocation1 + $0x38] sm:$0xff pattern:$0x73625140] }
   0xd   :  { %170 = vmatpush.bf16.msra.mxu2 %v107_v14  ;;  %184 = vmatpush.bf16.msra.mxu3 %v109_v15  ;;  %v111_v22 = vand.u32 %v2440_v4, %v79_v20  ;;  %v117_v23 = vand.u32 %v2440_v4, %v82_v21  ;;  %v80_v24 = vld.sshfl [vmem:[#allocation1 + $0x28] sm:$0xff pattern:$0x73625140]  ;;  %v2282_v57 = vld [vmem:[%s2940_s3 + $0xe0] sm:$0xff]  ;;  %v2273_v60 = vld [vmem:[%s2940_s3 + $0x98] sm:$0xff] }
   0xe   :  { %86 = vst [vmem:[#allocation1 + $0x20] ss:$4 sm:$0xff] %v33_v18  ;;  %v113_v25 = vand.u32 %v2440_v4, %v80_v24  ;;  %v2281_v61 = vld [vmem:[%s2940_s3 + $0xd8] sm:$0xff]  ;;  %v2272_v0 = vld [vmem:[%s2940_s3 + $0x90] sm:$0xff]  ;;  %v2255_v2 = vld [vmem:[%s2940_s3 + $0x8] sm:$0xff] }
   0xf   :  { %1709 = vmatmul.msk.bf16.vlgmr.msra.gmra.mxu0 %vm95_vm2, %v2455_v16  ;;  %1710 = vmatmul.msk.bf16.vlgmr.msra.gmra.mxu1 %vm95_vm2, %v2455_v16  ;;  %v2280_v1 = vld [vmem:[%s2940_s3 + $0xd0] sm:$0xff]  ;;  %v2263_v3 = vld [vmem:[%s2940_s3 + $0x48] sm:$0xff]  ;;  %v2254_v6 = vld [vmem:[%s2940_s3] sm:$0xff] }
  0x10   :  { %1711 = vmatmul.msk.bf16.vlgmr.msra.gmra.mxu2 %vm95_vm2, %v2455_v16  ;;  %1712 = vmatmul.msk.bf16.vlgmr.msra.gmra.mxu3 %vm95_vm2, %v2455_v16  ;;  %v2279_v5 = vld [vmem:[%s2940_s3 + $0xc8] sm:$0xff]  ;;  %v2262_v7 = vld [vmem:[%s2940_s3 + $0x40] sm:$0xff]  ;;  %v2293_v8 = vld [vmem:[%s2940_s3 + $0x138] sm:$0xff] }
  0x11   :  { %226 = vmatpush.bf16.msrb.mxu2 %v115_v19  ;;  %198 = vmatpush.bf16.msrb.mxu0 %v111_v22  ;;  %v2301_v9 = vld [vmem:[%s2940_s3 + $0x178] sm:$0xff]  ;;  %v2270_v10 = vld [vmem:[%s2940_s3 + $0x80] sm:$0xff]  ;;  %v2292_v14 = vld [vmem:[%s2940_s3 + $0x130] sm:$0xff] }
  0x12   :  { %240 = vmatpush.bf16.msrb.mxu3 %v117_v23  ;;  %212 = vmatpush.bf16.msrb.mxu1 %v113_v25  ;;  %v89_v26 = vld.sshfl [vmem:[#allocation1 + $0x10] sm:$0xff pattern:$0x73625140]  ;;  %v87_v27 = vld.sshfl [vmem:[#allocation1] sm:$0xff pattern:$0x73625140] }
  0x13   :  { %v123_v28 = vand.u32 %v2440_v4, %v89_v26  ;;  %v119_v29 = vand.u32 %v2440_v4, %v87_v27  ;;  %v90_v30 = vld.sshfl [vmem:[#allocation1 + $0x18] sm:$0xff pattern:$0x73625140]  ;;  %v88_v31 = vld.sshfl [vmem:[#allocation1 + $0x8] sm:$0xff pattern:$0x73625140] }
  0x14   :  { %v125_v32 = vand.u32 %v2440_v4, %v90_v30  ;;  %v121_v33 = vand.u32 %v2440_v4, %v88_v31  ;;  %v2278_v11 = vld [vmem:[%s2940_s3 + $0xc0] sm:$0xff]  ;;  %v2309_v12 = vld [vmem:[%s2940_s3 + $0x1b8] sm:$0xff]  ;;  %v2300_v15 = vld [vmem:[%s2940_s3 + $0x170] sm:$0xff] }
  0x15   :  { %282 = vmatpush.bf16.msra.mxu2 %v123_v28  ;;  %254 = vmatpush.bf16.msra.mxu0 %v119_v29  ;;  %v93_v34 = vld.sshfl [vmem:[#allocation1 + $0x30] sm:$0xff pattern:$0x73625140]  ;;  %v94_v35 = vld.sshfl [vmem:[#allocation1 + $0x38] sm:$0xff pattern:$0x73625140] }
  0x16   :  { %296 = vmatpush.bf16.msra.mxu3 %v125_v32  ;;  %268 = vmatpush.bf16.msra.mxu1 %v121_v33  ;;  %v91_v36 = vld.sshfl [vmem:[#allocation1 + $0x20] sm:$0xff pattern:$0x73625140]  ;;  %v131_v37 = vand.u32 %v2440_v4, %v93_v34  ;;  %v133_v38 = vand.u32 %v2440_v4, %v94_v35  ;;  %v92_v40 = vld.sshfl [vmem:[#allocation1 + $0x28] sm:$0xff pattern:$0x73625140] }
  0x17   :  { %v127_v39 = vand.u32 %v2440_v4, %v91_v36  ;;  %v129_v41 = vand.u32 %v2440_v4, %v92_v40  ;;  %v2271_v4 = vld [vmem:[%s2940_s3 + $0x88] sm:$0xff]  ;;  %v2317_v13 = vld [vmem:[%s2940_s3 + $0x1f8] sm:$0xff]  ;;  %v2316_v17 = vld [vmem:[%s2940_s3 + $0x1f0] sm:$0xff] }
  0x18   :  { %v2291_v18 = vld [vmem:[%s2940_s3 + $0x128] sm:$0xff]  ;;  %v2290_v22 = vld [vmem:[%s2940_s3 + $0x120] sm:$0xff]  ;;  %v2289_v24 = vld [vmem:[%s2940_s3 + $0x118] sm:$0xff] }
  0x19   :  { %v2299_v19 = vld [vmem:[%s2940_s3 + $0x168] sm:$0xff]  ;;  %v2298_v23 = vld [vmem:[%s2940_s3 + $0x160] sm:$0xff]  ;;  %v2297_v25 = vld [vmem:[%s2940_s3 + $0x158] sm:$0xff] }
  0x1a   :  { %v2307_v20 = vld [vmem:[%s2940_s3 + $0x1a8] sm:$0xff]  ;;  %v2306_v26 = vld [vmem:[%s2940_s3 + $0x1a0] sm:$0xff]  ;;  %v2288_v28 = vld [vmem:[%s2940_s3 + $0x110] sm:$0xff] }
  0x1b   :  { %v2315_v21 = vld [vmem:[%s2940_s3 + $0x1e8] sm:$0xff]  ;;  %v2314_v27 = vld [vmem:[%s2940_s3 + $0x1e0] sm:$0xff]  ;;  %v2296_v29 = vld [vmem:[%s2940_s3 + $0x150] sm:$0xff] }
  0x1c   :  { %v2305_v30 = vld [vmem:[%s2940_s3 + $0x198] sm:$0xff]  ;;  %v2287_v32 = vld [vmem:[%s2940_s3 + $0x108] sm:$0xff]  ;;  %v2304_v34 = vld [vmem:[%s2940_s3 + $0x190] sm:$0xff] }
  0x1d   :  { %v2313_v31 = vld [vmem:[%s2940_s3 + $0x1d8] sm:$0xff]  ;;  %v2295_v33 = vld [vmem:[%s2940_s3 + $0x148] sm:$0xff]  ;;  %v2312_v35 = vld [vmem:[%s2940_s3 + $0x1d0] sm:$0xff] }
  0x1e   :  { %v2286_v36 = vld [vmem:[%s2940_s3 + $0x100] sm:$0xff] }
  0x1f   :  { %1713 = vmatmul.msk.bf16.vlgmr.msrb.gmra.mxu0 %vm95_vm2, %v2455_v16  ;;  %1714 = vmatmul.msk.bf16.vlgmr.msrb.gmra.mxu1 %vm95_vm2, %v2455_v16  ;;  %v2302_v40 = vld [vmem:[%s2940_s3 + $0x180] sm:$0xff] }
  0x20   :  { %1715 = vmatmul.msk.bf16.vlgmr.msrb.gmra.mxu2 %vm95_vm2, %v2455_v16  ;;  %1716 = vmatmul.msk.bf16.vlgmr.msrb.gmra.mxu3 %vm95_vm2, %v2455_v16 }
  0x21   :  { %338 = vmatpush.bf16.msrb.mxu2 %v131_v37  ;;  %352 = vmatpush.bf16.msrb.mxu3 %v133_v38  ;;  %v2294_v37 = vld [vmem:[%s2940_s3 + $0x140] sm:$0xff]  ;;  %v2303_v38 = vld [vmem:[%s2940_s3 + $0x188] sm:$0xff] }
  0x22   :  { %310 = vmatpush.bf16.msrb.mxu0 %v127_v39  ;;  %324 = vmatpush.bf16.msrb.mxu1 %v129_v41  ;;  %v2311_v39 = vld [vmem:[%s2940_s3 + $0x1c8] sm:$0xff]  ;;  %v2310_v41 = vld [vmem:[%s2940_s3 + $0x1c0] sm:$0xff] }
  0x2f   :  { %1717 = vmatmul.msk.bf16.vlgmr.msra.gmra.mxu0 %vm95_vm2, %v2455_v16  ;;  %1718 = vmatmul.msk.bf16.vlgmr.msra.gmra.mxu1 %vm95_vm2, %v2455_v16 }
  0x30   :  { %1719 = vmatmul.msk.bf16.vlgmr.msra.gmra.mxu2 %vm95_vm2, %v2455_v16  ;;  %1720 = vmatmul.msk.bf16.vlgmr.msra.gmra.mxu3 %vm95_vm2, %v2455_v16 }
  0x31   :  { %1403 = vmatpush.bf16.msra.mxu0 %v2261_v42  ;;  %1417 = vmatpush.bf16.msra.mxu1 %v2269_v43 }
  0x32   :  { %1431 = vmatpush.bf16.msra.mxu2 %v2277_v44  ;;  %1445 = vmatpush.bf16.msra.mxu3 %v2285_v45  ;;  %v2699_v44 = vld [vmem:[%s2942_s2] sm:$0xff] }
  0x33   :  { %v38_v45 = vperm.slane %v2699_v44, 0 }
  0x35   :  { %1404 = vmatpush.bf16.msra.mxu0 %v2260_v46  ;;  %1418 = vmatpush.bf16.msra.mxu1 %v2268_v47  ;;  %v39_v46 = vperm.slane %v2699_v44, 1 }
  0x36   :  { %1432 = vmatpush.bf16.msra.mxu2 %v2276_v48  ;;  %1446 = vmatpush.bf16.msra.mxu3 %v2284_v49 }
  0x39   :  { %1405 = vmatpush.bf16.msra.mxu0 %v2259_v50  ;;  %1419 = vmatpush.bf16.msra.mxu1 %v2267_v51 }
  0x3a   :  { %1433 = vmatpush.bf16.msra.mxu2 %v2275_v52  ;;  %1447 = vmatpush.bf16.msra.mxu3 %v2283_v53 }
  0x3d   :  { %1406 = vmatpush.bf16.msra.mxu0 %v2258_v54  ;;  %1420 = vmatpush.bf16.msra.mxu1 %v2266_v55  ;;  %v2325_v55 = vld [vmem:[%s2940_s3 + $0x238] sm:$0xff] }
  0x3e   :  { %1434 = vmatpush.bf16.msra.mxu2 %v2274_v56  ;;  %1448 = vmatpush.bf16.msra.mxu3 %v2282_v57  ;;  %v2333_v56 = vld [vmem:[%s2940_s3 + $0x278] sm:$0xff] }
  0x3f   :  { %1721 = vmatmul.msk.bf16.vlgmr.msrb.gmra.mxu0 %vm95_vm2, %v2455_v16  ;;  %1722 = vmatmul.msk.bf16.vlgmr.msrb.gmra.mxu1 %vm95_vm2, %v2455_v16 }
  0x40   :  { %1723 = vmatmul.msk.bf16.vlgmr.msrb.gmra.mxu2 %vm95_vm2, %v2455_v16  ;;  %1724 = vmatmul.msk.bf16.vlgmr.msrb.gmra.mxu3 %vm95_vm2, %v2455_v16  ;;  %v2308_v16 = vld [vmem:[%s2940_s3 + $0x1b0] sm:$0xff] }
  0x41   :  { %1407 = vmatpush.bf16.msra.mxu0 %v2257_v58  ;;  %1421 = vmatpush.bf16.msra.mxu1 %v2265_v59  ;;  %v40_v59 = vperm.slane %v2699_v44, 2 }
  0x42   :  { %1435 = vmatpush.bf16.msra.mxu2 %v2273_v60  ;;  %1449 = vmatpush.bf16.msra.mxu3 %v2281_v61  ;;  %v41_v60 = vperm.slane %v2699_v44, 3  ;;  %v2324_v61 = vld [vmem:[%s2940_s3 + $0x230] sm:$0xff] }
  0x45   :  { %1408 = vmatpush.bf16.msra.mxu0 %v2256_v62  ;;  %1422 = vmatpush.bf16.msra.mxu1 %v2264_v63  ;;  %v2332_v62 = vld [vmem:[%s2940_s3 + $0x270] sm:$0xff] }
  0x46   :  { %1436 = vmatpush.bf16.msra.mxu2 %v2272_v0  ;;  %1450 = vmatpush.bf16.msra.mxu3 %v2280_v1 }
  0x49   :  { %1409 = vmatpush.bf16.msra.mxu0 %v2255_v2  ;;  %1423 = vmatpush.bf16.msra.mxu1 %v2263_v3 }
  0x4a   :  { %1437 = vmatpush.bf16.msra.mxu2 %v2271_v4  ;;  %1451 = vmatpush.bf16.msra.mxu3 %v2279_v5 }
  0x4d   :  { %1410 = vmatpush.bf16.msra.mxu0 %v2254_v6  ;;  %1424 = vmatpush.bf16.msra.mxu1 %v2262_v7  ;;  %v2341_v7 = vld [vmem:[%s2940_s3 + $0x2b8] sm:$0xff] }
  0x4e   :  { %1438 = vmatpush.bf16.msra.mxu2 %v2270_v10  ;;  %1452 = vmatpush.bf16.msra.mxu3 %v2278_v11  ;;  %v2323_v11 = vld [vmem:[%s2940_s3 + $0x228] sm:$0xff] }
  0x51   :  { %1459 = vmatpush.bf16.msrb.mxu0 %v2293_v8  ;;  %1473 = vmatpush.bf16.msrb.mxu1 %v2301_v9  ;;  %v2349_v8 = vld [vmem:[%s2940_s3 + $0x2f8] sm:$0xff] }
  0x52   :  { %1487 = vmatpush.bf16.msrb.mxu2 %v2309_v12  ;;  %1501 = vmatpush.bf16.msrb.mxu3 %v2317_v13  ;;  %v2331_v12 = vld [vmem:[%s2940_s3 + $0x268] sm:$0xff]  ;;  %v42_v13 = vperm.slane %v2699_v44, 4 }
  0x55   :  { %1460 = vmatpush.bf16.msrb.mxu0 %v2292_v14  ;;  %1474 = vmatpush.bf16.msrb.mxu1 %v2300_v15  ;;  %v43_v14 = vperm.slane %v2699_v44, 5  ;;  %v2340_v15 = vld [vmem:[%s2940_s3 + $0x2b0] sm:$0xff] }
  0x56   :  { %1488 = vmatpush.bf16.msrb.mxu2 %v2308_v16  ;;  %1502 = vmatpush.bf16.msrb.mxu3 %v2316_v17  ;;  %v2348_v16 = vld [vmem:[%s2940_s3 + $0x2f0] sm:$0xff]  ;;  %v2322_v17 = vld [vmem:[%s2940_s3 + $0x220] sm:$0xff] }
  0x59   :  { %1461 = vmatpush.bf16.msrb.mxu0 %v2291_v18  ;;  %1475 = vmatpush.bf16.msrb.mxu1 %v2299_v19  ;;  %v2330_v18 = vld [vmem:[%s2940_s3 + $0x260] sm:$0xff] }
  0x5a   :  { %1489 = vmatpush.bf16.msrb.mxu2 %v2307_v20  ;;  %1503 = vmatpush.bf16.msrb.mxu3 %v2315_v21 }
  0x5d   :  { %1462 = vmatpush.bf16.msrb.mxu0 %v2290_v22  ;;  %1476 = vmatpush.bf16.msrb.mxu1 %v2298_v23 }
  0x5e   :  { %1490 = vmatpush.bf16.msrb.mxu2 %v2306_v26  ;;  %1504 = vmatpush.bf16.msrb.mxu3 %v2314_v27  ;;  %v2339_v27 = vld [vmem:[%s2940_s3 + $0x2a8] sm:$0xff] }
  0x61   :  { %1463 = vmatpush.bf16.msrb.mxu0 %v2289_v24  ;;  %1477 = vmatpush.bf16.msrb.mxu1 %v2297_v25 }
  0x62   :  { %1491 = vmatpush.bf16.msrb.mxu2 %v2305_v30  ;;  %1505 = vmatpush.bf16.msrb.mxu3 %v2313_v31  ;;  %v45_v30 = vperm.slane %v2699_v44, 7  ;;  %v2329_v31 = vld [vmem:[%s2940_s3 + $0x258] sm:$0xff] }
  0x65   :  { %1464 = vmatpush.bf16.msrb.mxu0 %v2288_v28  ;;  %1478 = vmatpush.bf16.msrb.mxu1 %v2296_v29  ;;  %v2347_v28 = vld [vmem:[%s2940_s3 + $0x2e8] sm:$0xff]  ;;  %v44_v29 = vperm.slane %v2699_v44, 6 }
  0x66   :  { %1492 = vmatpush.bf16.msrb.mxu2 %v2304_v34  ;;  %1506 = vmatpush.bf16.msrb.mxu3 %v2312_v35  ;;  %v2321_v34 = vld [vmem:[%s2940_s3 + $0x218] sm:$0xff]  ;;  %v2338_v35 = vld [vmem:[%s2940_s3 + $0x2a0] sm:$0xff] }
  0x69   :  { %1465 = vmatpush.bf16.msrb.mxu0 %v2287_v32  ;;  %1479 = vmatpush.bf16.msrb.mxu1 %v2295_v33 }
  0x6a   :  { %1493 = vmatpush.bf16.msrb.mxu2 %v2303_v38  ;;  %1507 = vmatpush.bf16.msrb.mxu3 %v2311_v39  ;;  %v2328_v39 = vld [vmem:[%s2940_s3 + $0x250] sm:$0xff] }
  0x6d   :  { %1466 = vmatpush.bf16.msrb.mxu0 %v2286_v36  ;;  %1480 = vmatpush.bf16.msrb.mxu1 %v2294_v37  ;;  %v2346_v36 = vld [vmem:[%s2940_s3 + $0x2e0] sm:$0xff] }
  0x6e   :  { %1494 = vmatpush.bf16.msrb.mxu2 %v2302_v40  ;;  %1508 = vmatpush.bf16.msrb.mxu3 %v2310_v41 }
  0x8c   :  { %v144_v42 = vpop.f32.mrf.mxu0  ;;  %v158_v43 = vpop.f32.mrf.mxu1 }
  0x8d   :  { %v145_v47 = vadd.f32 %v144_v42, %v38_v45  ;;  %v159_v48 = vadd.f32 %v158_v43, %v39_v46  ;;  %v2320_v42 = vld [vmem:[%s2940_s3 + $0x210] sm:$0xff] }
  0x93   :  { %v172_v49 = vpop.f32.mrf.mxu2  ;;  %v186_v50 = vpop.f32.mrf.mxu3 }
  0x94   :  { %v146_v51 = vpop.f32.mrf.mxu0  ;;  %v160_v52 = vpop.f32.mrf.mxu1  ;;  %v173_v1 = vadd.f32 %v172_v49, %v40_v59  ;;  %v187_v2 = vadd.f32 %v186_v50, %v41_v60  ;;  %v2345_v49 = vld [vmem:[%s2940_s3 + $0x2d8] sm:$0xff] }
  0x95   :  { %v147_v53 = vadd.f32 %v146_v51, %v38_v45  ;;  %v161_v54 = vadd.f32 %v160_v52, %v39_v46  ;;  %v2772_v45 = vld [vmem:[%s2942_s2 + $0x8] sm:$0xff] }
  0x96   :  { %v2327_v52 = vld [vmem:[%s2940_s3 + $0x248] sm:$0xff] }
  0x97   :  { %v359_v57 = vpack.c.bf16 %v147_v53, %v145_v47  ;;  %v360_v58 = vpack.c.bf16 %v161_v54, %v159_v48  ;;  %v2337_v48 = vld [vmem:[%s2940_s3 + $0x298] sm:$0xff]  ;;  %v46_v53 = vperm.slane %v2772_v45, 0  ;;  %v2319_v54 = vld [vmem:[%s2940_s3 + $0x208] sm:$0xff] }
  0x99   :  { %1411 = vmatmul.bf16.vlgmr.msra.gmra.mxu0 %v359_v57  ;;  %1425 = vmatmul.bf16.vlgmr.msra.gmra.mxu1 %v360_v58  ;;  %v2344_v57 = vld [vmem:[%s2940_s3 + $0x2d0] sm:$0xff]  ;;  %v2326_v58 = vld [vmem:[%s2940_s3 + $0x240] sm:$0xff] }
  0x9a   :  { %1515 = vmatpush.bf16.msra.mxu0 %v2325_v55  ;;  %1529 = vmatpush.bf16.msra.mxu1 %v2333_v56  ;;  %v47_v55 = vperm.slane %v2772_v45, 1  ;;  %v2336_v56 = vld [vmem:[%s2940_s3 + $0x290] sm:$0xff] }
  0x9b   :  { %v174_v63 = vpop.f32.mrf.mxu2  ;;  %v188_v0 = vpop.f32.mrf.mxu3 }
  0x9c   :  { %v175_v3 = vadd.f32 %v174_v63, %v40_v59  ;;  %v189_v4 = vadd.f32 %v188_v0, %v41_v60  ;;  %v200_v5 = vpop.f32.mrf.mxu0  ;;  %v214_v6 = vpop.f32.mrf.mxu1  ;;  %v2365_v63 = vld [vmem:[%s2940_s3 + $0x378] sm:$0xff] }
  0x9d   :  { %v201_v19 = vadd.f32 %v200_v5, %v42_v13  ;;  %v215_v20 = vadd.f32 %v214_v6, %v43_v14  ;;  %v2335_v6 = vld [vmem:[%s2940_s3 + $0x288] sm:$0xff] }
  0x9e   :  { %v361_v9 = vpack.c.bf16 %v175_v3, %v173_v1  ;;  %v362_v10 = vpack.c.bf16 %v189_v4, %v187_v2  ;;  %1516 = vmatpush.bf16.msra.mxu0 %v2324_v61  ;;  %1530 = vmatpush.bf16.msra.mxu1 %v2332_v62  ;;  %v2318_v62 = vld [vmem:[%s2940_s3 + $0x200] sm:$0xff]  ;;  %v2357_v3 = vld [vmem:[%s2940_s3 + $0x338] sm:$0xff] }
  0xa0   :  { %1439 = vmatmul.bf16.vlgmr.msra.gmra.mxu2 %v361_v9  ;;  %1453 = vmatmul.bf16.vlgmr.msra.gmra.mxu3 %v362_v10  ;;  %v49_v9 = vperm.slane %v2772_v45, 3 }
  0xa1   :  { %1543 = vmatpush.bf16.msra.mxu2 %v2341_v7  ;;  %1557 = vmatpush.bf16.msra.mxu3 %v2349_v8  ;;  %v2343_v7 = vld [vmem:[%s2940_s3 + $0x2c8] sm:$0xff]  ;;  %v48_v8 = vperm.slane %v2772_v45, 2 }
  0xa2   :  { %1517 = vmatpush.bf16.msra.mxu0 %v2323_v11  ;;  %1531 = vmatpush.bf16.msra.mxu1 %v2331_v12  ;;  %v2364_v11 = vld [vmem:[%s2940_s3 + $0x370] sm:$0xff] }
  0xa3   :  { %v228_v21 = vpop.f32.mrf.mxu2  ;;  %v242_v22 = vpop.f32.mrf.mxu3 }
  0xa4   :  { %v202_v23 = vpop.f32.mrf.mxu0  ;;  %v216_v24 = vpop.f32.mrf.mxu1  ;;  %v229_v37 = vadd.f32 %v228_v21, %v44_v29  ;;  %v243_v38 = vadd.f32 %v242_v22, %v45_v30  ;;  %v2363_v22 = vld [vmem:[%s2940_s3 + $0x368] sm:$0xff] }
  0xa5   :  { %1544 = vmatpush.bf16.msra.mxu2 %v2340_v15  ;;  %1558 = vmatpush.bf16.msra.mxu3 %v2348_v16  ;;  %v203_v25 = vadd.f32 %v202_v23, %v42_v13  ;;  %v217_v26 = vadd.f32 %v216_v24, %v43_v14  ;;  %v2356_v13 = vld [vmem:[%s2940_s3 + $0x330] sm:$0xff]  ;;  %v2334_v14 = vld [vmem:[%s2940_s3 + $0x280] sm:$0xff] }
  0xa6   :  { %1518 = vmatpush.bf16.msra.mxu0 %v2322_v17  ;;  %1532 = vmatpush.bf16.msra.mxu1 %v2330_v18  ;;  %v2342_v15 = vld [vmem:[%s2940_s3 + $0x2c0] sm:$0xff]  ;;  %v2373_v18 = vld [vmem:[%s2940_s3 + $0x3b8] sm:$0xff] }
  0xa7   :  { %v363_v32 = vpack.c.bf16 %v203_v25, %v201_v19  ;;  %v364_v33 = vpack.c.bf16 %v217_v26, %v215_v20  ;;  %v2381_v19 = vld [vmem:[%s2940_s3 + $0x3f8] sm:$0xff]  ;;  %v2355_v25 = vld [vmem:[%s2940_s3 + $0x328] sm:$0xff] }
  0xa9   :  { %1545 = vmatpush.bf16.msra.mxu2 %v2339_v27  ;;  %1559 = vmatpush.bf16.msra.mxu3 %v2347_v28  ;;  %v2372_v28 = vld [vmem:[%s2940_s3 + $0x3b0] sm:$0xff] }
  0xaa   :  { %1467 = vmatmul.bf16.vlgmr.msrb.gmra.mxu0 %v363_v32  ;;  %1533 = vmatpush.bf16.msra.mxu1 %v2329_v31  ;;  %v2354_v31 = vld [vmem:[%s2940_s3 + $0x320] sm:$0xff]  ;;  %v2371_v32 = vld [vmem:[%s2940_s3 + $0x3a8] sm:$0xff] }
  0xab   :  { %1519 = vmatpush.bf16.msra.mxu0 %v2321_v34  ;;  %v230_v40 = vpop.f32.mrf.mxu2  ;;  %v244_v41 = vpop.f32.mrf.mxu3  ;;  %1481 = vmatmul.bf16.vlgmr.msrb.gmra.mxu1 %v364_v33  ;;  %v2379_v33 = vld [vmem:[%s2940_s3 + $0x3e8] sm:$0xff] }
  0xac   :  { %v231_v43 = vadd.f32 %v230_v40, %v44_v29  ;;  %v245_v44 = vadd.f32 %v244_v41, %v45_v30  ;;  %v256_v46 = vpop.f32.mrf.mxu0  ;;  %v270_v47 = vpop.f32.mrf.mxu1  ;;  %v2380_v29 = vld [vmem:[%s2940_s3 + $0x3f0] sm:$0xff]  ;;  %v2362_v30 = vld [vmem:[%s2940_s3 + $0x360] sm:$0xff] }
  0xad   :  { %1546 = vmatpush.bf16.msra.mxu2 %v2338_v35  ;;  %1560 = vmatpush.bf16.msra.mxu3 %v2346_v36  ;;  %v257_v59 = vadd.f32 %v256_v46, %v46_v53  ;;  %v271_v0 = vadd.f32 %v270_v47, %v47_v55  ;;  %v2361_v36 = vld [vmem:[%s2940_s3 + $0x358] sm:$0xff]  ;;  %v2360_v40 = vld [vmem:[%s2940_s3 + $0x350] sm:$0xff]  ;;  %v50_v47 = vperm.slane %v2772_v45, 4 }
  0xae   :  { %v365_v50 = vpack.c.bf16 %v231_v43, %v229_v37  ;;  %v366_v51 = vpack.c.bf16 %v245_v44, %v243_v38  ;;  %1534 = vmatpush.bf16.msra.mxu1 %v2328_v39  ;;  %v2353_v37 = vld [vmem:[%s2940_s3 + $0x318] sm:$0xff]  ;;  %v2370_v38 = vld [vmem:[%s2940_s3 + $0x3a0] sm:$0xff]  ;;  %v2352_v41 = vld [vmem:[%s2940_s3 + $0x310] sm:$0xff] }
  0xaf   :  { %1520 = vmatpush.bf16.msra.mxu0 %v2320_v42  ;;  %v2378_v39 = vld [vmem:[%s2940_s3 + $0x3e0] sm:$0xff]  ;;  %v2369_v44 = vld [vmem:[%s2940_s3 + $0x398] sm:$0xff] }
  0xb0   :  { %1495 = vmatmul.bf16.vlgmr.msrb.gmra.mxu2 %v365_v50  ;;  %1509 = vmatmul.bf16.vlgmr.msrb.gmra.mxu3 %v366_v51  ;;  %v2377_v46 = vld [vmem:[%s2940_s3 + $0x3d8] sm:$0xff]  ;;  %v2351_v50 = vld [vmem:[%s2940_s3 + $0x308] sm:$0xff] }
  0xb1   :  { %1547 = vmatpush.bf16.msra.mxu2 %v2337_v48  ;;  %1561 = vmatpush.bf16.msra.mxu3 %v2345_v49  ;;  %v51_v48 = vperm.slane %v2772_v45, 5  ;;  %v2359_v49 = vld [vmem:[%s2940_s3 + $0x348] sm:$0xff] }
  0xb2   :  { %1535 = vmatpush.bf16.msra.mxu1 %v2327_v52 }
  0xb3   :  { %1521 = vmatpush.bf16.msra.mxu0 %v2319_v54  ;;  %v284_v60 = vpop.f32.mrf.mxu2  ;;  %v298_v61 = vpop.f32.mrf.mxu3  ;;  %v2376_v54 = vld [vmem:[%s2940_s3 + $0x3d0] sm:$0xff] }
  0xb4   :  { %v258_v1 = vpop.f32.mrf.mxu0  ;;  %v272_v2 = vpop.f32.mrf.mxu1  ;;  %v285_v16 = vadd.f32 %v284_v60, %v48_v8  ;;  %v299_v17 = vadd.f32 %v298_v61, %v49_v9  ;;  %v2350_v60 = vld [vmem:[%s2940_s3 + $0x300] sm:$0xff]  ;;  %v52_v61 = vperm.slane %v2772_v45, 6 }
  0xb5   :  { %1548 = vmatpush.bf16.msra.mxu2 %v2336_v56  ;;  %1562 = vmatpush.bf16.msra.mxu3 %v2344_v57  ;;  %v259_v4 = vadd.f32 %v258_v1, %v46_v53  ;;  %v273_v5 = vadd.f32 %v272_v2, %v47_v55  ;;  %v2368_v53 = vld [vmem:[%s2940_s3 + $0x390] sm:$0xff] }
  0xb6   :  { %1536 = vmatpush.bf16.msra.mxu1 %v2326_v58 }
  0xb7   :  { %v367_v10 = vpack.c.bf16 %v259_v4, %v257_v59  ;;  %1522 = vmatpush.bf16.msra.mxu0 %v2318_v62  ;;  %v368_v12 = vpack.c.bf16 %v273_v5, %v271_v0  ;;  %v2358_v59 = vld [vmem:[%s2940_s3 + $0x340] sm:$0xff]  ;;  %v2367_v62 = vld [vmem:[%s2940_s3 + $0x388] sm:$0xff]  ;;  %v53_v0 = vperm.slane %v2772_v45, 7 }
  0xb9   :  { %1549 = vmatpush.bf16.msra.mxu2 %v2335_v6  ;;  %1563 = vmatpush.bf16.msra.mxu3 %v2343_v7  ;;  %v2366_v6 = vld [vmem:[%s2940_s3 + $0x380] sm:$0xff] }
  0xba   :  { %1585 = vmatpush.bf16.msrb.mxu1 %v2365_v63  ;;  %1523 = vmatmul.bf16.vlgmr.msra.gmra.mxu0 %v367_v10  ;;  %v2375_v63 = vld [vmem:[%s2940_s3 + $0x3c8] sm:$0xff]  ;;  %v2374_v7 = vld [vmem:[%s2940_s3 + $0x3c0] sm:$0xff] }
  0xbb   :  { %1571 = vmatpush.bf16.msrb.mxu0 %v2357_v3  ;;  %v286_v20 = vpop.f32.mrf.mxu2  ;;  %v300_v21 = vpop.f32.mrf.mxu3  ;;  %1537 = vmatmul.bf16.vlgmr.msra.gmra.mxu1 %v368_v12 }
  0xbc   :  { %v287_v23 = vadd.f32 %v286_v20, %v48_v8  ;;  %v301_v24 = vadd.f32 %v300_v21, %v49_v9  ;;  %v312_v34 = vpop.f32.mrf.mxu0  ;;  %v326_v35 = vpop.f32.mrf.mxu1 }
  0xbd   :  { %1550 = vmatpush.bf16.msra.mxu2 %v2334_v14  ;;  %1564 = vmatpush.bf16.msra.mxu3 %v2342_v15  ;;  %v313_v55 = vadd.f32 %v312_v34, %v50_v47  ;;  %v327_v56 = vadd.f32 %v326_v35, %v51_v48 }
  0xbe   :  { %1586 = vmatpush.bf16.msrb.mxu1 %v2364_v11  ;;  %v369_v26 = vpack.c.bf16 %v287_v23, %v285_v16  ;;  %v370_v27 = vpack.c.bf16 %v301_v24, %v299_v17 }
  0xbf   :  { %1572 = vmatpush.bf16.msrb.mxu0 %v2356_v13 }
  0xc0   :  { %1551 = vmatmul.bf16.vlgmr.msra.gmra.mxu2 %v369_v26  ;;  %1565 = vmatmul.bf16.vlgmr.msra.gmra.mxu3 %v370_v27 }
  0xc1   :  { %1599 = vmatpush.bf16.msrb.mxu2 %v2373_v18  ;;  %1613 = vmatpush.bf16.msrb.mxu3 %v2381_v19  ;;  %v2387_v18 = vld [vmem:[%s2941_s4] ss:$0 sm:$0xff] }
  0xc2   :  { %1587 = vmatpush.bf16.msrb.mxu1 %v2363_v22 }
  0xc3   :  { %1573 = vmatpush.bf16.msrb.mxu0 %v2355_v25  ;;  %v340_v42 = vpop.f32.mrf.mxu2  ;;  %v354_v43 = vpop.f32.mrf.mxu3 }
  0xc4   :  { %v314_v51 = vpop.f32.mrf.mxu0  ;;  %v328_v52 = vpop.f32.mrf.mxu1  ;;  %v341_v5 = vadd.f32 %v340_v42, %v52_v61  ;;  %v355_v8 = vadd.f32 %v354_v43, %v53_v0 }
  0xc5   :  { %1600 = vmatpush.bf16.msrb.mxu2 %v2372_v28  ;;  %1614 = vmatpush.bf16.msrb.mxu3 %v2380_v29  ;;  %v315_v57 = vadd.f32 %v314_v51, %v50_v47  ;;  %v329_v58 = vadd.f32 %v328_v52, %v51_v48 }
  0xc6   :  { %1588 = vmatpush.bf16.msrb.mxu1 %v2362_v30 }
  0xc7   :  { %1574 = vmatpush.bf16.msrb.mxu0 %v2354_v31  ;;  %v371_v1 = vpack.c.bf16 %v315_v57, %v313_v55  ;;  %v372_v2 = vpack.c.bf16 %v329_v58, %v327_v56  ;;  %v2385_v56 = vld [vmem:[%s2944_s5 + $0x18] sm:$0xff] }
  0xc9   :  { %1601 = vmatpush.bf16.msrb.mxu2 %v2371_v32  ;;  %1615 = vmatpush.bf16.msrb.mxu3 %v2379_v33 }
  0xca   :  { %1589 = vmatpush.bf16.msrb.mxu1 %v2361_v36 }
  0xcb   :  { %1575 = vmatpush.bf16.msrb.mxu0 %v2353_v37  ;;  %v342_v3 = vpop.f32.mrf.mxu2  ;;  %v356_v4 = vpop.f32.mrf.mxu3 }
  0xcc   :  { %v343_v9 = vadd.f32 %v342_v3, %v52_v61  ;;  %v357_v45 = vadd.f32 %v356_v4, %v53_v0  ;;  %v2384_v61 = vld [vmem:[%s2944_s5 + $0x10] sm:$0xff] }
  0xcd   :  { %1602 = vmatpush.bf16.msrb.mxu2 %v2370_v38  ;;  %1616 = vmatpush.bf16.msrb.mxu3 %v2378_v39 }
  0xce   :  { %1590 = vmatpush.bf16.msrb.mxu1 %v2360_v40  ;;  %v373_v10 = vpack.c.bf16 %v343_v9, %v341_v5  ;;  %v374_v11 = vpack.c.bf16 %v357_v45, %v355_v8  ;;  %v2382_v9 = vld [vmem:[%s2944_s5] sm:$0xff] }
  0xcf   :  { %1576 = vmatpush.bf16.msrb.mxu0 %v2352_v41 }
  0xd1   :  { %1603 = vmatpush.bf16.msrb.mxu2 %v2369_v44  ;;  %1617 = vmatpush.bf16.msrb.mxu3 %v2377_v46 }
  0xd2   :  { %1591 = vmatpush.bf16.msrb.mxu1 %v2359_v49 }
  0xd3   :  { %1577 = vmatpush.bf16.msrb.mxu0 %v2351_v50 }
  0xd5   :  { %1604 = vmatpush.bf16.msrb.mxu2 %v2368_v53  ;;  %1618 = vmatpush.bf16.msrb.mxu3 %v2376_v54 }
  0xd6   :  { %1592 = vmatpush.bf16.msrb.mxu1 %v2358_v59 }
  0xd7   :  { %1578 = vmatpush.bf16.msrb.mxu0 %v2350_v60 }
  0xd9   :  { %1605 = vmatpush.bf16.msrb.mxu2 %v2367_v62  ;;  %1619 = vmatpush.bf16.msrb.mxu3 %v2375_v63 }
  0xda   :  { %1579 = vmatmul.bf16.vlgmr.msrb.gmra.mxu0 %v371_v1  ;;  %1593 = vmatmul.bf16.vlgmr.msrb.gmra.mxu1 %v372_v2  ;;  %v2383_v2 = vld [vmem:[%s2944_s5 + $0x8] sm:$0xff] }
  0xdb   :  { %1690 = vmatpush.bf16.msra.mxu0 %v2385_v56 }
  0xdd   :  { %1606 = vmatpush.bf16.msrb.mxu2 %v2366_v6  ;;  %1620 = vmatpush.bf16.msrb.mxu3 %v2374_v7 }
  0xdf   :  { %1691 = vmatpush.bf16.msra.mxu0 %v2384_v61 }
  0xe0   :  { %1607 = vmatmul.bf16.vlgmr.msrb.gmra.mxu2 %v373_v10  ;;  %1621 = vmatmul.bf16.vlgmr.msrb.gmra.mxu3 %v374_v11 }
  0xe3   :  { %1692 = vmatpush.bf16.msra.mxu0 %v2383_v2 }
  0xe7   :  { %1693 = vmatpush.bf16.msra.mxu0 %v2382_v9 }
 0x116   :  { %v1412_v12 = vpop.f32.mrf.mxu0  ;;  %v1426_v13 = vpop.f32.mrf.mxu1 }
 0x117   :  { %v1413_v22 = vadd.f32 %v2387_v18, %v1412_v12 }
 0x119   :  { %v1427_v24 = vadd.f32 %v1426_v13, %v1413_v22 }
 0x11e   :  { %v1414_v14 = vpop.f32.mrf.mxu0  ;;  %v1428_v17 = vpop.f32.mrf.mxu1 }
 0x11f   :  { %v1415_v29 = vadd.f32 %v2387_v18, %v1414_v14 }
 0x121   :  { %v1429_v31 = vadd.f32 %v1428_v17, %v1415_v29 }
 0x123   :  { %v1440_v15 = vpop.f32.mrf.mxu2  ;;  %v1454_v16 = vpop.f32.mrf.mxu3 }
 0x124   :  { %v1441_v25 = vadd.f32 %v1440_v15, %v1427_v24 }
 0x126   :  { %v1455_v30 = vadd.f32 %v1454_v16, %v1441_v25 }
 0x127   :  { %v1468_v19 = vpop.f32.mrf.mxu0 }
 0x128   :  { %v1482_v23 = vpop.f32.mrf.mxu1  ;;  %v1469_v33 = vadd.f32 %v1468_v19, %v1455_v30 }
 0x12a   :  { %v1483_v38 = vadd.f32 %v1482_v23, %v1469_v33 }
 0x12b   :  { %v1442_v20 = vpop.f32.mrf.mxu2  ;;  %v1456_v21 = vpop.f32.mrf.mxu3 }
 0x12c   :  { %v1443_v34 = vadd.f32 %v1442_v20, %v1429_v31 }
 0x12e   :  { %v1457_v39 = vadd.f32 %v1456_v21, %v1443_v34 }
 0x12f   :  { %v1470_v26 = vpop.f32.mrf.mxu0 }
 0x130   :  { %v1484_v32 = vpop.f32.mrf.mxu1  ;;  %v1471_v41 = vadd.f32 %v1470_v26, %v1457_v39 }
 0x132   :  { %v1485_v44 = vadd.f32 %v1484_v32, %v1471_v41 }
 0x133   :  { %v1496_v27 = vpop.f32.mrf.mxu2  ;;  %v1510_v28 = vpop.f32.mrf.mxu3 }
 0x134   :  { %v1497_v40 = vadd.f32 %v1496_v27, %v1483_v38 }
 0x136   :  { %v1511_v43 = vadd.f32 %v1510_v28, %v1497_v40 }
 0x137   :  { %v1524_v35 = vpop.f32.mrf.mxu0 }
 0x138   :  { %v1538_v42 = vpop.f32.mrf.mxu1  ;;  %v1525_v49 = vadd.f32 %v1524_v35, %v1511_v43 }
 0x13a   :  { %v1539_v51 = vadd.f32 %v1538_v42, %v1525_v49 }
 0x13b   :  { %v1498_v36 = vpop.f32.mrf.mxu2  ;;  %v1512_v37 = vpop.f32.mrf.mxu3 }
 0x13c   :  { %v1499_v50 = vadd.f32 %v1498_v36, %v1485_v44  ;;  %v2388_v36 = vld [vmem:[%s2943_s6] ss:$0 sm:$0xff] }
 0x13e   :  { %v1513_v52 = vadd.f32 %v1512_v37, %v1499_v50 }
 0x13f   :  { %v1526_v46 = vpop.f32.mrf.mxu0 }
 0x140   :  { %v1540_v53 = vpop.f32.mrf.mxu1  ;;  %v1527_v57 = vadd.f32 %v1526_v46, %v1513_v52 }
 0x142   :  { %v1541_v62 = vadd.f32 %v1540_v53, %v1527_v57 }
 0x143   :  { %v1552_v47 = vpop.f32.mrf.mxu2  ;;  %v1566_v48 = vpop.f32.mrf.mxu3 }
 0x144   :  { %v1553_v54 = vadd.f32 %v1552_v47, %v1539_v51 }
 0x146   :  { %v1567_v60 = vadd.f32 %v1566_v48, %v1553_v54 }
 0x14b   :  { %v1554_v58 = vpop.f32.mrf.mxu2  ;;  %v1568_v59 = vpop.f32.mrf.mxu3 }
 0x14c   :  { %v1555_v1 = vadd.f32 %v1554_v58, %v1541_v62 }
 0x14e   :  { %v1569_v7 = vadd.f32 %v1568_v59, %v1555_v1 }
 0x157   :  { %v1580_v55 = vpop.f32.mrf.mxu0  ;;  %v1594_v0 = vpop.f32.mrf.mxu1 }
 0x158   :  { %v1581_v63 = vadd.f32 %v1580_v55, %v1567_v60 }
 0x15a   :  { %v1595_v3 = vadd.f32 %v1594_v0, %v1581_v63 }
 0x15f   :  { %v1582_v4 = vpop.f32.mrf.mxu0  ;;  %v1596_v12 = vpop.f32.mrf.mxu1 }
 0x160   :  { %v1583_v45 = vadd.f32 %v1582_v4, %v1569_v7 }
 0x162   :  { %v1597_v13 = vadd.f32 %v1596_v12, %v1583_v45 }
 0x163   :  { %v1608_v5 = vpop.f32.mrf.mxu2  ;;  %v1622_v6 = vpop.f32.mrf.mxu3 }
 0x164   :  { %v1609_v8 = vadd.f32 %v1608_v5, %v1595_v3 }
 0x166   :  { %v1623_v10 = vadd.f32 %v1622_v6, %v1609_v8 }
 0x168   :  { %v1627_v11 = vmul.f32 %v1623_v10, %v1623_v10 }
 0x16a   :  { %v1629_v14 = vmul.f32 %v1627_v11, %v1623_v10 }
 0x16b   :  { %v1610_v15 = vpop.f32.mrf.mxu2  ;;  %v1624_v18 = vpop.f32.mrf.mxu3 }
 0x16c   :  { %v1631_v16 = vmul.f32 0.044715, %v1629_v14  ;;  %v1611_v17 = vadd.f32 %v1610_v15, %v1597_v13 }
 0x16e   :  { %v1633_v19 = vadd.f32 %v1631_v16, %v1623_v10  ;;  %v1625_v20 = vadd.f32 %v1624_v18, %v1611_v17 }
 0x170   :  { %v1635_v21 = vmul.f32 0.7978846, %v1633_v19  ;;  %v1628_v22 = vmul.f32 %v1625_v20, %v1625_v20 }
 0x172   :  { %v1630_v23 = vmul.f32 %v1628_v22, %v1625_v20  ;;  %2389 = vtanh.f32 %v1635_v21 }
 0x174   :  { %v1632_v24 = vmul.f32 0.044715, %v1630_v23 }
 0x176   :  { %v1634_v25 = vadd.f32 %v1632_v24, %v1625_v20 }
 0x178   :  { %v1636_v26 = vmul.f32 0.7978846, %v1634_v25  ;;  %v2390_v27 = vpop.eup %2389 }
 0x179   :  { %v1639_v28 = vadd.f32 1.0, %v2390_v27 }
 0x17a   :  { %2391 = vtanh.f32 %v1636_v26 }
 0x17b   :  { %v1641_v30 = vmul.f32 0.5, %v1639_v28 }
 0x17d   :  { %v1643_v33 = vmul.f32 %v1641_v30, %v1623_v10 }
 0x180   :  { %v2392_v29 = vpop.eup %2391 }
 0x181   :  { %v1640_v31 = vadd.f32 1.0, %v2392_v29 }
 0x183   :  { %v1642_v32 = vmul.f32 0.5, %v1640_v31 }
 0x185   :  { %v1644_v34 = vmul.f32 %v1642_v32, %v1625_v20 }
 0x187   :  { %v1645_v35 = vpack.c.bf16 %v1644_v34, %v1643_v33 }
 0x189   :  { %2253 = vmatmul.msk.bf16.vlgmr.msra.gmra.mxu0 %vm1682_vm3, %v1645_v35 }
 0x206   :  { %v1695_v37 = vpop.f32.mrf.mxu0 }
 0x207   :  { %v1696_v38 = vadd.f32 %v2388_v36, %v1695_v37 }
 0x209   :  { %v1700_v39 = vpack.c.bf16 %v1696_v38, %v1696_v38 }
 0x20b   :  { %1703 = vst.msk [vmem:[%s2945_s7] sm:$0xf] %vm1702_vm4, %v1700_v39 }
 0x20e   :  { %v1697_v40 = vpop.f32.mrf.mxu0 }
 0x20f   :  { %v1698_v41 = vadd.f32 %v2388_v36, %v1697_v40 }
 0x211   :  { %v1701_v42 = vpack.c.bf16 %v1698_v41, %v1698_v41 }
 0x213   :  { %1704 = vst.msk [vmem:[%s2945_s7 + $0x4] sm:$0xf] %vm1702_vm4, %v1701_v42 }

</bundles_post_ra>
